<compile_context>
chip_gen: v7x
topology: tpu7x:2x2x1
jax: 0.10.0
libtpu: 0.0.40
codegen_flags: <defaults>
</compile_context>

<pallas_src>
import functools

import jax
import jax.numpy as jnp
from jax import lax
from jax.experimental import pallas as pl
from jax.experimental.pallas import tpu as pltpu


# Lane order of the 4 fused LSTM instances inside the packed state / gate axes.
_INSTANCES = ("q_f", "r_f", "q_b", "r_b")             # quote-fwd, resp-fwd, quote-bwd, resp-bwd
_SRC_ROW = {"q_f": 0, "r_f": 1, "q_b": 0, "r_b": 1}   # row block inside packed W_ih (quote / response)


# ---------------------------------------------------------------------------
# Fused Pallas kernel: 4 LSTM instances (2 sources x 2 directions), full sequence.
# ---------------------------------------------------------------------------
def _fused_bilstm_kernel(xq_ref, xr_ref, wih_ref, whh_ref, b_ref, h0_ref, c0_ref,
                         out_f_ref, out_b_ref, gx_scr, h_scr, c_scr, *, T, BP, H):
    # xq_ref, xr_ref: (T*BP, E)  time-major rows, batch padded to BP (multiple of 8)
    # wih_ref: (2E, 16H)  input->gate weights, block-diagonal by source
    #                     (rows 0:E = quote embedding dims, rows E:2E = response)
    # whh_ref: (4H, 16H)  hidden->gate weights, block-diagonal by instance
    # b_ref:   (1, 16H)   combined b_ih + b_hh, packed
    # h0_ref, c0_ref: (BP, 4H)  packed initial states, lanes [q_f | r_f | q_b | r_b]
    # out_f_ref: (T, BP, 2H)  forward outputs  [q_f | r_f] at original time t
    # out_b_ref: (T, BP, 2H)  backward outputs [q_b | r_b] at original time t
    # gx_scr: (T, BP, 16H)  hoisted input projection (backward lanes time-reversed)
    # h_scr, c_scr: (BP, 4H)  packed running state
    E = xq_ref.shape[1]
    GH = 4 * H          # one packed gate block (all 4 instances)  -> 128 lanes
    NG = 4 * GH         # full packed gate width (i|f|g|o)         -> 512 lanes
    HALF = 2 * H        # forward half of the packed state         -> 64 lanes

    # ---- Phase 1: hoisted input projection (one shot, M = T*BP = 64). ----
    proj = (jnp.dot(xq_ref[...], wih_ref[0:E, :],
                    preferred_element_type=jnp.float32)
            + jnp.dot(xr_ref[...], wih_ref[E:2 * E, :],
                      preferred_element_type=jnp.float32)
            + b_ref[...])                                           # (T*BP, 16H)

    # Within every 4H gate block the first 2H lanes belong to the forward
    # instances and the last 2H to the backward ones.
    lane = lax.broadcasted_iota(jnp.int32, (BP, NG), 1)
    is_fwd = (lane % GH) < HALF

    # Unpack per-timestep, with backward lanes already time-reversed so the
    # recurrence below only ever reads gx_scr[t] (one dense read per step).
    for tt in range(T):
        fwd_rows = proj[tt * BP:(tt + 1) * BP, :]
        bwd_rows = proj[(T - 1 - tt) * BP:(T - tt) * BP, :]
        gx_scr[tt] = jnp.where(is_fwd, fwd_rows, bwd_rows)

    # ---- Phase 2: fused recurrence over T steps. ----
    h_scr[...] = h0_ref[...]
    c_scr[...] = c0_ref[...]

    def step(t, carry):
        h = h_scr[...]                                              # (BP, 4H)
        c = c_scr[...]
        gates = gx_scr[t] + jnp.dot(h, whh_ref[...],
                                    preferred_element_type=jnp.float32)  # (BP, 16H)
        # 128-lane-aligned slabs; PyTorch gate order i, f, g, o.
        i_f = jax.nn.sigmoid(gates[:, 0:2 * GH])
        g = jnp.tanh(gates[:, 2 * GH:3 * GH])
        o = jax.nn.sigmoid(gates[:, 3 * GH:4 * GH])
        i = i_f[:, 0:GH]
        f = i_f[:, GH:2 * GH]
        c_new = f * c + i * g
        h_new = o * jnp.tanh(c_new)
        h_scr[...] = h_new
        c_scr[...] = c_new
        # Forward instances produced the hidden state for time t, backward ones
        # for time T-1-t: store each half at its original time index.
        out_f_ref[t] = h_new[:, 0:HALF]
        out_b_ref[T - 1 - t] = h_new[:, HALF:2 * HALF]
        return carry

    lax.fori_loop(0, T, step, 0, unroll=True)


def _fused_bilstm(xq2, xr2, wih, whh, bias, h0, c0, *, T, BP, H):
    kernel = functools.partial(_fused_bilstm_kernel, T=T, BP=BP, H=H)
    vmem = pl.BlockSpec(memory_space=pltpu.MemorySpace.VMEM)
    out_shape = (jax.ShapeDtypeStruct((T, BP, 2 * H), jnp.float32),
                 jax.ShapeDtypeStruct((T, BP, 2 * H), jnp.float32))
    return pl.pallas_call(
        kernel,
        out_shape=out_shape,
        in_specs=[vmem] * 7,
        out_specs=(vmem, vmem),
        scratch_shapes=[
            pltpu.VMEM((T, BP, 16 * H), jnp.float32),   # hoisted gates_x
            pltpu.VMEM((BP, 4 * H), jnp.float32),       # packed h state
            pltpu.VMEM((BP, 4 * H), jnp.float32),       # packed c state
        ],
    )(xq2, xr2, wih, whh, bias, h0, c0)


# ---------------------------------------------------------------------------
# TextBiLSTM forward (do_BN=False config).  Embedding gather + tiny layout glue
# stay in XLA; both bidirectional LSTMs run in one fused Pallas call.
# ---------------------------------------------------------------------------
def text_bilstm_forward(params, X_q_inputs, X_r_inputs, q_init_state, r_init_state):
    emb = params["embedding"]
    packed = params["packed"]
    H = packed["whh"].shape[0] // 4
    xq = jnp.take(emb, X_q_inputs, axis=0)              # (B, T, E)
    xr = jnp.take(emb, X_r_inputs, axis=0)
    B, T, E = xq.shape
    BP = ((B + 7) // 8) * 8                             # pad batch to a sublane multiple

    # do_BN=False -> BatchNorm1d branch skipped, exactly like the PyTorch forward.
    def to_rows(x_bte):                                 # (B,T,E) -> (T*BP, E)
        x_tbe = jnp.transpose(x_bte, (1, 0, 2))
        x_tbe = jnp.pad(x_tbe, ((0, 0), (0, BP - B), (0, 0)))
        return x_tbe.reshape(T * BP, E)

    qh0, qc0 = q_init_state                             # each (2, B, H): [fwd, bwd]
    rh0, rc0 = r_init_state

    def pack_state(qs, rs):                             # -> (BP, 4H): [q_f|r_f|q_b|r_b]
        s = jnp.concatenate([qs[0], rs[0], qs[1], rs[1]], axis=-1)
        return jnp.pad(s, ((0, BP - B), (0, 0)))

    out_f, out_b = _fused_bilstm(
        to_rows(xq), to_rows(xr), packed["wih"], packed["whh"], packed["b"],
        pack_state(qh0, rh0), pack_state(qc0, rc0), T=T, BP=BP, H=H)

    out_f = jnp.transpose(out_f[:, :B, :], (1, 0, 2))   # (B, T, 2H): [q_f | r_f]
    out_b = jnp.transpose(out_b[:, :B, :], (1, 0, 2))   # (B, T, 2H): [q_b | r_b]
    quote_outputs = jnp.concatenate([out_f[..., 0:H], out_b[..., 0:H]], axis=-1)
    response_outputs = jnp.concatenate([out_f[..., H:2 * H], out_b[..., H:2 * H]], axis=-1)
    return quote_outputs, response_outputs


# ---------------------------------------------------------------------------
# Parameter init (PyTorch nn.LSTM-style) + packing into the fused kernel layout.
# ---------------------------------------------------------------------------
def _init_lstm_direction(key, E, H):
    k = 1.0 / jnp.sqrt(jnp.float32(H))
    ks = jax.random.split(key, 4)

    def u(kk, shape):
        return jax.random.uniform(kk, shape, jnp.float32, minval=-k, maxval=k)

    return {"w_ih": u(ks[0], (4 * H, E)), "w_hh": u(ks[1], (4 * H, H)),
            "b_ih": u(ks[2], (4 * H,)), "b_hh": u(ks[3], (4 * H,))}


def _pack_params(dirs, E, H):
    GH = 4 * H
    NG = 4 * GH
    wih = jnp.zeros((2 * E, NG), jnp.float32)
    whh = jnp.zeros((GH, NG), jnp.float32)
    bias = jnp.zeros((1, NG), jnp.float32)
    for d, name in enumerate(_INSTANCES):
        p = dirs[name]
        r0 = _SRC_ROW[name] * E
        for g in range(4):                               # PyTorch gate order i, f, g, o
            col = g * GH + d * H
            wih = wih.at[r0:r0 + E, col:col + H].set(p["w_ih"][g * H:(g + 1) * H, :].T)
            whh = whh.at[d * H:(d + 1) * H, col:col + H].set(p["w_hh"][g * H:(g + 1) * H, :].T)
            bias = bias.at[0, col:col + H].set(
                p["b_ih"][g * H:(g + 1) * H] + p["b_hh"][g * H:(g + 1) * H])
    return {"wih": wih, "whh": whh, "b": bias}


def init_text_bilstm_params(key, vocabulary_size, embedding_size, hidden_size):
    k_emb, kqf, kqb, krf, krb = jax.random.split(key, 5)
    embedding = jax.random.normal(k_emb, (vocabulary_size, embedding_size), jnp.float32)
    embedding = embedding.at[0].set(0.0)                 # self.embedding.weight.data[0] = 0
    dirs = {"q_f": _init_lstm_direction(kqf, embedding_size, hidden_size),
            "q_b": _init_lstm_direction(kqb, embedding_size, hidden_size),
            "r_f": _init_lstm_direction(krf, embedding_size, hidden_size),
            "r_b": _init_lstm_direction(krb, embedding_size, hidden_size)}
    return {"embedding": embedding, "dirs": dirs,
            "packed": _pack_params(dirs, embedding_size, hidden_size)}


# ---------------------------------------------------------------------------
# Pure-JAX reference (lax.scan, per direction) used to check the fused kernel.
# ---------------------------------------------------------------------------
def _ref_lstm_dir(x_tbe, p, h0, c0):
    H = h0.shape[-1]
    wih_t = p["w_ih"].T
    whh_t = p["w_hh"].T
    bias = p["b_ih"] + p["b_hh"]

    def step(carry, x_t):
        h, c = carry
        gates = x_t @ wih_t + h @ whh_t + bias
        i = jax.nn.sigmoid(gates[:, 0:H])
        f = jax.nn.sigmoid(gates[:, H:2 * H])
        g = jnp.tanh(gates[:, 2 * H:3 * H])
        o = jax.nn.sigmoid(gates[:, 3 * H:4 * H])
        c_new = f * c + i * g
        h_new = o * jnp.tanh(c_new)
        return (h_new, c_new), h_new

    _, out = lax.scan(step, (h0, c0), x_tbe)
    return out


def _ref_bilstm(x_bte, dir_f, dir_b, init_state):
    h0, c0 = init_state
    x_tbe = jnp.transpose(x_bte, (1, 0, 2))
    out_f = _ref_lstm_dir(x_tbe, dir_f, h0[0], c0[0])
    out_b = _ref_lstm_dir(x_tbe[::-1], dir_b, h0[1], c0[1])[::-1]
    return jnp.transpose(jnp.concatenate([out_f, out_b], axis=-1), (1, 0, 2))


def _ref_forward(params, xq_ids, xr_ids, q_state, r_state):
    emb = params["embedding"]
    d = params["dirs"]
    xq = jnp.take(emb, xq_ids, axis=0)
    xr = jnp.take(emb, xr_ids, axis=0)
    return (_ref_bilstm(xq, d["q_f"], d["q_b"], q_state),
            _ref_bilstm(xr, d["r_f"], d["r_b"], r_state))


# ---------------------------------------------------------------------------
if __name__ == "__main__":
    # Config mirroring the module (do_BN=False, dropout unused in forward).
    config = dict(
        word2id={f"w{i}": i + 1 for i in range(30)},     # vocabulary_size = 31
        pretrain_emb=False,
        embedding_size=32,
        hidden_size=32,
        layer_num=1,
        do_BN=False,
        dropout=0.0,
        lstm_dropout=0.0,
    )
    vocab_size = len(config["word2id"]) + 1
    E, H, L = config["embedding_size"], config["hidden_size"], config["layer_num"]
    B, T = 2, 8

    key = jax.random.PRNGKey(0)
    k_param, k_q, k_r, k_s = jax.random.split(key, 4)
    params = init_text_bilstm_params(k_param, vocab_size, E, H)

    X_q_inputs = jax.random.randint(k_q, (B, T), 0, vocab_size, dtype=jnp.int32)
    X_r_inputs = jax.random.randint(k_r, (B, T), 0, vocab_size, dtype=jnp.int32)

    # init_hidden() would give zeros of shape (layer_num*2, B, H); use small random
    # states instead so the h0/c0 packing path is also exercised by the check.
    ks = jax.random.split(k_s, 4)
    q_init_state = (0.1 * jax.random.normal(ks[0], (L * 2, B, H), jnp.float32),
                    0.1 * jax.random.normal(ks[1], (L * 2, B, H), jnp.float32))
    r_init_state = (0.1 * jax.random.normal(ks[2], (L * 2, B, H), jnp.float32),
                    0.1 * jax.random.normal(ks[3], (L * 2, B, H), jnp.float32))

    fwd = jax.jit(functools.partial(text_bilstm_forward, params))
    quote_out, response_out = fwd(X_q_inputs, X_r_inputs, q_init_state, r_init_state)
    jax.block_until_ready((quote_out, response_out))

    assert quote_out.shape == (B, T, 2 * H) and response_out.shape == (B, T, 2 * H)

    ref_q, ref_r = _ref_forward(params, X_q_inputs, X_r_inputs, q_init_state, r_init_state)
    assert jnp.allclose(quote_out, ref_q, atol=1e-5, rtol=1e-5), \
        float(jnp.max(jnp.abs(quote_out - ref_q)))
    assert jnp.allclose(response_out, ref_r, atol=1e-5, rtol=1e-5), \
        float(jnp.max(jnp.abs(response_out - ref_r)))

    # TODO(synk): multi-layer stacking (layer_num > 1) with inter-layer lstm_dropout
    # not needed for this config; BatchNorm1d branch skipped because do_BN=False.
    print("KERNEL_OK")
</pallas_src>

<mosaic_0001>
module attributes {stable_mosaic.version = 11 : i64} {
  func.func @_fused_bilstm_kernel(%arg0: memref<64x32xf32, #tpu.memory_space<vmem>>, %arg1: memref<64x32xf32, #tpu.memory_space<vmem>>, %arg2: memref<64x512xf32, #tpu.memory_space<vmem>>, %arg3: memref<128x512xf32, #tpu.memory_space<vmem>>, %arg4: memref<1x512xf32, #tpu.memory_space<vmem>>, %arg5: memref<8x128xf32, #tpu.memory_space<vmem>>, %arg6: memref<8x128xf32, #tpu.memory_space<vmem>>, %arg7: memref<8x8x64xf32, #tpu.memory_space<vmem>>, %arg8: memref<8x8x64xf32, #tpu.memory_space<vmem>>, %arg9: memref<8x8x512xf32, #tpu.memory_space<vmem>>, %arg10: memref<8x128xf32, #tpu.memory_space<vmem>>, %arg11: memref<8x128xf32, #tpu.memory_space<vmem>>) attributes {dimension_semantics = [], scalar_prefetch = 0 : i64, scratch_operands = 3 : i64, tpu.core_type = #tpu.core_type<tc>} {
    %c0 = arith.constant 0 : index
    %c0_0 = arith.constant 0 : index
    %0 = vector.load %arg0[%c0, %c0_0] : memref<64x32xf32, #tpu.memory_space<vmem>>, vector<64x32xf32>
    %c0_1 = arith.constant 0 : index
    %c0_2 = arith.constant 0 : index
    %1 = vector.load %arg2[%c0_1, %c0_2] : memref<64x512xf32, #tpu.memory_space<vmem>>, vector<32x512xf32>
    %cst = arith.constant dense<0.000000e+00> : vector<64x512xf32>
    %2 = tpu.matmul %0, %1, %cst {dimension_numbers = #tpu.dot_dimension_numbers<[1], [0], [0], [1], [0, 0, 1, 1], [], []>} : vector<64x32xf32>, vector<32x512xf32>, vector<64x512xf32> -> vector<64x512xf32>
    %c0_3 = arith.constant 0 : index
    %c0_4 = arith.constant 0 : index
    %3 = vector.load %arg1[%c0_3, %c0_4] : memref<64x32xf32, #tpu.memory_space<vmem>>, vector<64x32xf32>
    %c32 = arith.constant 32 : index
    %c0_5 = arith.constant 0 : index
    %4 = vector.load %arg2[%c32, %c0_5] : memref<64x512xf32, #tpu.memory_space<vmem>>, vector<32x512xf32>
    %cst_6 = arith.constant dense<0.000000e+00> : vector<64x512xf32>
    %5 = tpu.matmul %3, %4, %cst_6 {dimension_numbers = #tpu.dot_dimension_numbers<[1], [0], [0], [1], [0, 0, 1, 1], [], []>} : vector<64x32xf32>, vector<32x512xf32>, vector<64x512xf32> -> vector<64x512xf32>
    %6 = arith.addf %2, %5 : vector<64x512xf32>
    %c0_7 = arith.constant 0 : index
    %c0_8 = arith.constant 0 : index
    %7 = vector.load %arg4[%c0_7, %c0_8] : memref<1x512xf32, #tpu.memory_space<vmem>>, vector<1x512xf32>
    %8 = vector.broadcast %7 : vector<1x512xf32> to vector<64x512xf32>
    %9 = arith.addf %6, %8 : vector<64x512xf32>
    %10 = tpu.iota {dimensions = array<i32: 1>} : vector<8x512xi32>
    %c128_i32 = arith.constant 128 : i32
    %c0_i32 = arith.constant 0 : i32
    %11 = arith.cmpi eq, %c128_i32, %c0_i32 : i32
    %c1_i32 = arith.constant 1 : i32
    %12 = arith.select %11, %c1_i32, %c128_i32 : i32
    %13 = vector.broadcast %12 : i32 to vector<8x512xi32>
    %14 = arith.remsi %10, %13 : vector<8x512xi32>
    %c0_i32_9 = arith.constant 0 : i32
    %15 = vector.broadcast %c0_i32_9 : i32 to vector<8x512xi32>
    %16 = arith.cmpi ne, %14, %15 : vector<8x512xi32>
    %c0_i32_10 = arith.constant 0 : i32
    %17 = vector.broadcast %c0_i32_10 : i32 to vector<8x512xi32>
    %18 = arith.cmpi slt, %14, %17 : vector<8x512xi32>
    %c0_i32_11 = arith.constant 0 : i32
    %19 = arith.cmpi slt, %12, %c0_i32_11 : i32
    %20 = vector.broadcast %19 : i1 to vector<8x512xi1>
    %21 = vector.broadcast %20 : vector<8x512xi1> to vector<8x512xi1>
    %22 = arith.xori %18, %21 : vector<8x512xi1>
    %23 = arith.andi %22, %16 : vector<8x512xi1>
    %24 = vector.broadcast %12 : i32 to vector<8x512xi32>
    %25 = arith.addi %14, %24 : vector<8x512xi32>
    %26 = arith.select %23, %25, %14 : vector<8x512xi1>, vector<8x512xi32>
    %c64_i32 = arith.constant 64 : i32
    %27 = vector.broadcast %c64_i32 : i32 to vector<8x512xi32>
    %28 = arith.cmpi slt, %26, %27 : vector<8x512xi32>
    %29 = vector.extract_strided_slice %9 {offsets = [0, 0], sizes = [8, 512], strides = [1, 1]} : vector<64x512xf32> to vector<8x512xf32>
    %30 = vector.extract_strided_slice %9 {offsets = [56, 0], sizes = [8, 512], strides = [1, 1]} : vector<64x512xf32> to vector<8x512xf32>
    %31 = arith.select %28, %29, %30 : vector<8x512xi1>, vector<8x512xf32>
    %c0_12 = arith.constant 0 : index
    %c0_13 = arith.constant 0 : index
    %c0_14 = arith.constant 0 : index
    %32 = vector.load %arg9[%c0_12, %c0_13, %c0_14] : memref<8x8x512xf32, #tpu.memory_space<vmem>>, vector<1x8x512xf32>
    %33 = vector.shape_cast %32 : vector<1x8x512xf32> to vector<8x512xf32>
    %34 = vector.shape_cast %31 : vector<8x512xf32> to vector<1x8x512xf32>
    tpu.vector_store %arg9[%c0_12, %c0_13, %c0_14], %34 {strides = array<i32>} : memref<8x8x512xf32, #tpu.memory_space<vmem>>, vector<1x8x512xf32>,
    %35 = vector.extract_strided_slice %9 {offsets = [8, 0], sizes = [8, 512], strides = [1, 1]} : vector<64x512xf32> to vector<8x512xf32>
    %36 = vector.extract_strided_slice %9 {offsets = [48, 0], sizes = [8, 512], strides = [1, 1]} : vector<64x512xf32> to vector<8x512xf32>
    %37 = arith.select %28, %35, %36 : vector<8x512xi1>, vector<8x512xf32>
    %c1 = arith.constant 1 : index
    %c0_15 = arith.constant 0 : index
    %c0_16 = arith.constant 0 : index
    %38 = vector.load %arg9[%c1, %c0_15, %c0_16] : memref<8x8x512xf32, #tpu.memory_space<vmem>>, vector<1x8x512xf32>
    %39 = vector.shape_cast %38 : vector<1x8x512xf32> to vector<8x512xf32>
    %40 = vector.shape_cast %37 : vector<8x512xf32> to vector<1x8x512xf32>
    tpu.vector_store %arg9[%c1, %c0_15, %c0_16], %40 {strides = array<i32>} : memref<8x8x512xf32, #tpu.memory_space<vmem>>, vector<1x8x512xf32>,
    %41 = vector.extract_strided_slice %9 {offsets = [16, 0], sizes = [8, 512], strides = [1, 1]} : vector<64x512xf32> to vector<8x512xf32>
    %42 = vector.extract_strided_slice %9 {offsets = [40, 0], sizes = [8, 512], strides = [1, 1]} : vector<64x512xf32> to vector<8x512xf32>
    %43 = arith.select %28, %41, %42 : vector<8x512xi1>, vector<8x512xf32>
    %c2 = arith.constant 2 : index
    %c0_17 = arith.constant 0 : index
    %c0_18 = arith.constant 0 : index
    %44 = vector.load %arg9[%c2, %c0_17, %c0_18] : memref<8x8x512xf32, #tpu.memory_space<vmem>>, vector<1x8x512xf32>
    %45 = vector.shape_cast %44 : vector<1x8x512xf32> to vector<8x512xf32>
    %46 = vector.shape_cast %43 : vector<8x512xf32> to vector<1x8x512xf32>
    tpu.vector_store %arg9[%c2, %c0_17, %c0_18], %46 {strides = array<i32>} : memref<8x8x512xf32, #tpu.memory_space<vmem>>, vector<1x8x512xf32>,
    %47 = vector.extract_strided_slice %9 {offsets = [24, 0], sizes = [8, 512], strides = [1, 1]} : vector<64x512xf32> to vector<8x512xf32>
    %48 = vector.extract_strided_slice %9 {offsets = [32, 0], sizes = [8, 512], strides = [1, 1]} : vector<64x512xf32> to vector<8x512xf32>
    %49 = arith.select %28, %47, %48 : vector<8x512xi1>, vector<8x512xf32>
    %c3 = arith.constant 3 : index
    %c0_19 = arith.constant 0 : index
    %c0_20 = arith.constant 0 : index
    %50 = vector.load %arg9[%c3, %c0_19, %c0_20] : memref<8x8x512xf32, #tpu.memory_space<vmem>>, vector<1x8x512xf32>
    %51 = vector.shape_cast %50 : vector<1x8x512xf32> to vector<8x512xf32>
    %52 = vector.shape_cast %49 : vector<8x512xf32> to vector<1x8x512xf32>
    tpu.vector_store %arg9[%c3, %c0_19, %c0_20], %52 {strides = array<i32>} : memref<8x8x512xf32, #tpu.memory_space<vmem>>, vector<1x8x512xf32>,
    %53 = vector.extract_strided_slice %9 {offsets = [32, 0], sizes = [8, 512], strides = [1, 1]} : vector<64x512xf32> to vector<8x512xf32>
    %54 = vector.extract_strided_slice %9 {offsets = [24, 0], sizes = [8, 512], strides = [1, 1]} : vector<64x512xf32> to vector<8x512xf32>
    %55 = arith.select %28, %53, %54 : vector<8x512xi1>, vector<8x512xf32>
    %c4 = arith.constant 4 : index
    %c0_21 = arith.constant 0 : index
    %c0_22 = arith.constant 0 : index
    %56 = vector.load %arg9[%c4, %c0_21, %c0_22] : memref<8x8x512xf32, #tpu.memory_space<vmem>>, vector<1x8x512xf32>
    %57 = vector.shape_cast %56 : vector<1x8x512xf32> to vector<8x512xf32>
    %58 = vector.shape_cast %55 : vector<8x512xf32> to vector<1x8x512xf32>
    tpu.vector_store %arg9[%c4, %c0_21, %c0_22], %58 {strides = array<i32>} : memref<8x8x512xf32, #tpu.memory_space<vmem>>, vector<1x8x512xf32>,
    %59 = vector.extract_strided_slice %9 {offsets = [40, 0], sizes = [8, 512], strides = [1, 1]} : vector<64x512xf32> to vector<8x512xf32>
    %60 = vector.extract_strided_slice %9 {offsets = [16, 0], sizes = [8, 512], strides = [1, 1]} : vector<64x512xf32> to vector<8x512xf32>
    %61 = arith.select %28, %59, %60 : vector<8x512xi1>, vector<8x512xf32>
    %c5 = arith.constant 5 : index
    %c0_23 = arith.constant 0 : index
    %c0_24 = arith.constant 0 : index
    %62 = vector.load %arg9[%c5, %c0_23, %c0_24] : memref<8x8x512xf32, #tpu.memory_space<vmem>>, vector<1x8x512xf32>
    %63 = vector.shape_cast %62 : vector<1x8x512xf32> to vector<8x512xf32>
    %64 = vector.shape_cast %61 : vector<8x512xf32> to vector<1x8x512xf32>
    tpu.vector_store %arg9[%c5, %c0_23, %c0_24], %64 {strides = array<i32>} : memref<8x8x512xf32, #tpu.memory_space<vmem>>, vector<1x8x512xf32>,
    %65 = vector.extract_strided_slice %9 {offsets = [48, 0], sizes = [8, 512], strides = [1, 1]} : vector<64x512xf32> to vector<8x512xf32>
    %66 = vector.extract_strided_slice %9 {offsets = [8, 0], sizes = [8, 512], strides = [1, 1]} : vector<64x512xf32> to vector<8x512xf32>
    %67 = arith.select %28, %65, %66 : vector<8x512xi1>, vector<8x512xf32>
    %c6 = arith.constant 6 : index
    %c0_25 = arith.constant 0 : index
    %c0_26 = arith.constant 0 : index
    %68 = vector.load %arg9[%c6, %c0_25, %c0_26] : memref<8x8x512xf32, #tpu.memory_space<vmem>>, vector<1x8x512xf32>
    %69 = vector.shape_cast %68 : vector<1x8x512xf32> to vector<8x512xf32>
    %70 = vector.shape_cast %67 : vector<8x512xf32> to vector<1x8x512xf32>
    tpu.vector_store %arg9[%c6, %c0_25, %c0_26], %70 {strides = array<i32>} : memref<8x8x512xf32, #tpu.memory_space<vmem>>, vector<1x8x512xf32>,
    %71 = vector.extract_strided_slice %9 {offsets = [56, 0], sizes = [8, 512], strides = [1, 1]} : vector<64x512xf32> to vector<8x512xf32>
    %72 = vector.extract_strided_slice %9 {offsets = [0, 0], sizes = [8, 512], strides = [1, 1]} : vector<64x512xf32> to vector<8x512xf32>
    %73 = arith.select %28, %71, %72 : vector<8x512xi1>, vector<8x512xf32>
    %c7 = arith.constant 7 : index
    %c0_27 = arith.constant 0 : index
    %c0_28 = arith.constant 0 : index
    %74 = vector.load %arg9[%c7, %c0_27, %c0_28] : memref<8x8x512xf32, #tpu.memory_space<vmem>>, vector<1x8x512xf32>
    %75 = vector.shape_cast %74 : vector<1x8x512xf32> to vector<8x512xf32>
    %76 = vector.shape_cast %73 : vector<8x512xf32> to vector<1x8x512xf32>
    tpu.vector_store %arg9[%c7, %c0_27, %c0_28], %76 {strides = array<i32>} : memref<8x8x512xf32, #tpu.memory_space<vmem>>, vector<1x8x512xf32>,
    %c0_29 = arith.constant 0 : index
    %c0_30 = arith.constant 0 : index
    %77 = vector.load %arg5[%c0_29, %c0_30] : memref<8x128xf32, #tpu.memory_space<vmem>>, vector<8x128xf32>
    %c0_31 = arith.constant 0 : index
    %c0_32 = arith.constant 0 : index
    %78 = vector.load %arg10[%c0_31, %c0_32] : memref<8x128xf32, #tpu.memory_space<vmem>>, vector<8x128xf32>
    tpu.vector_store %arg10[%c0_31, %c0_32], %77 {strides = array<i32>} : memref<8x128xf32, #tpu.memory_space<vmem>>, vector<8x128xf32>,
    %c0_33 = arith.constant 0 : index
    %c0_34 = arith.constant 0 : index
    %79 = vector.load %arg6[%c0_33, %c0_34] : memref<8x128xf32, #tpu.memory_space<vmem>>, vector<8x128xf32>
    %c0_35 = arith.constant 0 : index
    %c0_36 = arith.constant 0 : index
    %80 = vector.load %arg11[%c0_35, %c0_36] : memref<8x128xf32, #tpu.memory_space<vmem>>, vector<8x128xf32>
    tpu.vector_store %arg11[%c0_35, %c0_36], %79 {strides = array<i32>} : memref<8x128xf32, #tpu.memory_space<vmem>>, vector<8x128xf32>,
    %c0_i32_37 = arith.constant 0 : i32
    %c0_38 = arith.constant 0 : index
    %c0_39 = arith.constant 0 : index
    %81 = vector.load %arg10[%c0_38, %c0_39] : memref<8x128xf32, #tpu.memory_space<vmem>>, vector<8x128xf32>
    %c0_40 = arith.constant 0 : index
    %c0_41 = arith.constant 0 : index
    %82 = vector.load %arg11[%c0_40, %c0_41] : memref<8x128xf32, #tpu.memory_space<vmem>>, vector<8x128xf32>
    %83 = arith.index_cast %c0_i32_37 : i32 to index
    %c0_42 = arith.constant 0 : index
    %c0_43 = arith.constant 0 : index
    %84 = vector.load %arg9[%83, %c0_42, %c0_43] : memref<8x8x512xf32, #tpu.memory_space<vmem>>, vector<1x8x512xf32>
    %85 = vector.shape_cast %84 : vector<1x8x512xf32> to vector<8x512xf32>
    %c0_44 = arith.constant 0 : index
    %c0_45 = arith.constant 0 : index
    %86 = vector.load %arg3[%c0_44, %c0_45] : memref<128x512xf32, #tpu.memory_space<vmem>>, vector<128x512xf32>
    %cst_46 = arith.constant dense<0.000000e+00> : vector<8x512xf32>
    %87 = tpu.matmul %81, %86, %cst_46 {dimension_numbers = #tpu.dot_dimension_numbers<[1], [0], [0], [1], [0, 0, 1, 1], [], []>} : vector<8x128xf32>, vector<128x512xf32>, vector<8x512xf32> -> vector<8x512xf32>
    %88 = arith.addf %85, %87 : vector<8x512xf32>
    %89 = vector.extract_strided_slice %88 {offsets = [0, 0], sizes = [8, 256], strides = [1, 1]} : vector<8x512xf32> to vector<8x256xf32>
    %90 = arith.negf %89 : vector<8x256xf32>
    %91 = math.exp %90 : vector<8x256xf32>
    %cst_47 = arith.constant 1.000000e+00 : f32
    %92 = vector.broadcast %cst_47 : f32 to vector<8x256xf32>
    %93 = arith.addf %92, %91 : vector<8x256xf32>
    %94 = arith.divf %92, %93 : vector<8x256xf32>
    %95 = vector.extract_strided_slice %88 {offsets = [0, 256], sizes = [8, 128], strides = [1, 1]} : vector<8x512xf32> to vector<8x128xf32>
    %96 = math.tanh %95 : vector<8x128xf32>
    %97 = vector.extract_strided_slice %88 {offsets = [0, 384], sizes = [8, 128], strides = [1, 1]} : vector<8x512xf32> to vector<8x128xf32>
    %98 = arith.negf %97 : vector<8x128xf32>
    %99 = math.exp %98 : vector<8x128xf32>
    %cst_48 = arith.constant 1.000000e+00 : f32
    %100 = vector.broadcast %cst_48 : f32 to vector<8x128xf32>
    %101 = arith.addf %100, %99 : vector<8x128xf32>
    %102 = arith.divf %100, %101 : vector<8x128xf32>
    %103 = vector.extract_strided_slice %94 {offsets = [0, 0], sizes = [8, 128], strides = [1, 1]} : vector<8x256xf32> to vector<8x128xf32>
    %104 = vector.extract_strided_slice %94 {offsets = [0, 128], sizes = [8, 128], strides = [1, 1]} : vector<8x256xf32> to vector<8x128xf32>
    %105 = arith.mulf %104, %82 : vector<8x128xf32>
    %106 = arith.mulf %103, %96 : vector<8x128xf32>
    %107 = arith.addf %105, %106 : vector<8x128xf32>
    %108 = math.tanh %107 : vector<8x128xf32>
    %109 = arith.mulf %102, %108 : vector<8x128xf32>
    %c0_49 = arith.constant 0 : index
    %c0_50 = arith.constant 0 : index
    %110 = vector.load %arg10[%c0_49, %c0_50] : memref<8x128xf32, #tpu.memory_space<vmem>>, vector<8x128xf32>
    tpu.vector_store %arg10[%c0_49, %c0_50], %109 {strides = array<i32>} : memref<8x128xf32, #tpu.memory_space<vmem>>, vector<8x128xf32>,
    %c0_51 = arith.constant 0 : index
    %c0_52 = arith.constant 0 : index
    %111 = vector.load %arg11[%c0_51, %c0_52] : memref<8x128xf32, #tpu.memory_space<vmem>>, vector<8x128xf32>
    tpu.vector_store %arg11[%c0_51, %c0_52], %107 {strides = array<i32>} : memref<8x128xf32, #tpu.memory_space<vmem>>, vector<8x128xf32>,
    %112 = vector.extract_strided_slice %109 {offsets = [0, 0], sizes = [8, 64], strides = [1, 1]} : vector<8x128xf32> to vector<8x64xf32>
    %113 = arith.index_cast %c0_i32_37 : i32 to index
    %c0_53 = arith.constant 0 : index
    %c0_54 = arith.constant 0 : index
    %114 = vector.load %arg7[%113, %c0_53, %c0_54] : memref<8x8x64xf32, #tpu.memory_space<vmem>>, vector<1x8x64xf32>
    %115 = vector.shape_cast %114 : vector<1x8x64xf32> to vector<8x64xf32>
    %116 = vector.shape_cast %112 : vector<8x64xf32> to vector<1x8x64xf32>
    tpu.vector_store %arg7[%113, %c0_53, %c0_54], %116 {strides = array<i32>} : memref<8x8x64xf32, #tpu.memory_space<vmem>>, vector<1x8x64xf32>,
    %117 = vector.extract_strided_slice %109 {offsets = [0, 64], sizes = [8, 64], strides = [1, 1]} : vector<8x128xf32> to vector<8x64xf32>
    %c7_i32 = arith.constant 7 : i32
    %118 = arith.subi %c7_i32, %c0_i32_37 : i32
    %119 = arith.index_cast %118 : i32 to index
    %c0_55 = arith.constant 0 : index
    %c0_56 = arith.constant 0 : index
    %120 = vector.load %arg8[%119, %c0_55, %c0_56] : memref<8x8x64xf32, #tpu.memory_space<vmem>>, vector<1x8x64xf32>
    %121 = vector.shape_cast %120 : vector<1x8x64xf32> to vector<8x64xf32>
    %122 = vector.shape_cast %117 : vector<8x64xf32> to vector<1x8x64xf32>
    tpu.vector_store %arg8[%119, %c0_55, %c0_56], %122 {strides = array<i32>} : memref<8x8x64xf32, #tpu.memory_space<vmem>>, vector<1x8x64xf32>,
    %c1_i32_57 = arith.constant 1 : i32
    %c0_58 = arith.constant 0 : index
    %c0_59 = arith.constant 0 : index
    %123 = vector.load %arg10[%c0_58, %c0_59] : memref<8x128xf32, #tpu.memory_space<vmem>>, vector<8x128xf32>
    %c0_60 = arith.constant 0 : index
    %c0_61 = arith.constant 0 : index
    %124 = vector.load %arg11[%c0_60, %c0_61] : memref<8x128xf32, #tpu.memory_space<vmem>>, vector<8x128xf32>
    %125 = arith.index_cast %c1_i32_57 : i32 to index
    %c0_62 = arith.constant 0 : index
    %c0_63 = arith.constant 0 : index
    %126 = vector.load %arg9[%125, %c0_62, %c0_63] : memref<8x8x512xf32, #tpu.memory_space<vmem>>, vector<1x8x512xf32>
    %127 = vector.shape_cast %126 : vector<1x8x512xf32> to vector<8x512xf32>
    %c0_64 = arith.constant 0 : index
    %c0_65 = arith.constant 0 : index
    %128 = vector.load %arg3[%c0_64, %c0_65] : memref<128x512xf32, #tpu.memory_space<vmem>>, vector<128x512xf32>
    %cst_66 = arith.constant dense<0.000000e+00> : vector<8x512xf32>
    %129 = tpu.matmul %123, %128, %cst_66 {dimension_numbers = #tpu.dot_dimension_numbers<[1], [0], [0], [1], [0, 0, 1, 1], [], []>} : vector<8x128xf32>, vector<128x512xf32>, vector<8x512xf32> -> vector<8x512xf32>
    %130 = arith.addf %127, %129 : vector<8x512xf32>
    %131 = vector.extract_strided_slice %130 {offsets = [0, 0], sizes = [8, 256], strides = [1, 1]} : vector<8x512xf32> to vector<8x256xf32>
    %132 = arith.negf %131 : vector<8x256xf32>
    %133 = math.exp %132 : vector<8x256xf32>
    %cst_67 = arith.constant 1.000000e+00 : f32
    %134 = vector.broadcast %cst_67 : f32 to vector<8x256xf32>
    %135 = arith.addf %134, %133 : vector<8x256xf32>
    %136 = arith.divf %134, %135 : vector<8x256xf32>
    %137 = vector.extract_strided_slice %130 {offsets = [0, 256], sizes = [8, 128], strides = [1, 1]} : vector<8x512xf32> to vector<8x128xf32>
    %138 = math.tanh %137 : vector<8x128xf32>
    %139 = vector.extract_strided_slice %130 {offsets = [0, 384], sizes = [8, 128], strides = [1, 1]} : vector<8x512xf32> to vector<8x128xf32>
    %140 = arith.negf %139 : vector<8x128xf32>
    %141 = math.exp %140 : vector<8x128xf32>
    %cst_68 = arith.constant 1.000000e+00 : f32
    %142 = vector.broadcast %cst_68 : f32 to vector<8x128xf32>
    %143 = arith.addf %142, %141 : vector<8x128xf32>
    %144 = arith.divf %142, %143 : vector<8x128xf32>
    %145 = vector.extract_strided_slice %136 {offsets = [0, 0], sizes = [8, 128], strides = [1, 1]} : vector<8x256xf32> to vector<8x128xf32>
    %146 = vector.extract_strided_slice %136 {offsets = [0, 128], sizes = [8, 128], strides = [1, 1]} : vector<8x256xf32> to vector<8x128xf32>
    %147 = arith.mulf %146, %124 : vector<8x128xf32>
    %148 = arith.mulf %145, %138 : vector<8x128xf32>
    %149 = arith.addf %147, %148 : vector<8x128xf32>
    %150 = math.tanh %149 : vector<8x128xf32>
    %151 = arith.mulf %144, %150 : vector<8x128xf32>
    %c0_69 = arith.constant 0 : index
    %c0_70 = arith.constant 0 : index
    %152 = vector.load %arg10[%c0_69, %c0_70] : memref<8x128xf32, #tpu.memory_space<vmem>>, vector<8x128xf32>
    tpu.vector_store %arg10[%c0_69, %c0_70], %151 {strides = array<i32>} : memref<8x128xf32, #tpu.memory_space<vmem>>, vector<8x128xf32>,
    %c0_71 = arith.constant 0 : index
    %c0_72 = arith.constant 0 : index
    %153 = vector.load %arg11[%c0_71, %c0_72] : memref<8x128xf32, #tpu.memory_space<vmem>>, vector<8x128xf32>
    tpu.vector_store %arg11[%c0_71, %c0_72], %149 {strides = array<i32>} : memref<8x128xf32, #tpu.memory_space<vmem>>, vector<8x128xf32>,
    %154 = vector.extract_strided_slice %151 {offsets = [0, 0], sizes = [8, 64], strides = [1, 1]} : vector<8x128xf32> to vector<8x64xf32>
    %155 = arith.index_cast %c1_i32_57 : i32 to index
    %c0_73 = arith.constant 0 : index
    %c0_74 = arith.constant 0 : index
    %156 = vector.load %arg7[%155, %c0_73, %c0_74] : memref<8x8x64xf32, #tpu.memory_space<vmem>>, vector<1x8x64xf32>
    %157 = vector.shape_cast %156 : vector<1x8x64xf32> to vector<8x64xf32>
    %158 = vector.shape_cast %154 : vector<8x64xf32> to vector<1x8x64xf32>
    tpu.vector_store %arg7[%155, %c0_73, %c0_74], %158 {strides = array<i32>} : memref<8x8x64xf32, #tpu.memory_space<vmem>>, vector<1x8x64xf32>,
    %159 = vector.extract_strided_slice %151 {offsets = [0, 64], sizes = [8, 64], strides = [1, 1]} : vector<8x128xf32> to vector<8x64xf32>
    %c7_i32_75 = arith.constant 7 : i32
    %160 = arith.subi %c7_i32_75, %c1_i32_57 : i32
    %161 = arith.index_cast %160 : i32 to index
    %c0_76 = arith.constant 0 : index
    %c0_77 = arith.constant 0 : index
    %162 = vector.load %arg8[%161, %c0_76, %c0_77] : memref<8x8x64xf32, #tpu.memory_space<vmem>>, vector<1x8x64xf32>
    %163 = vector.shape_cast %162 : vector<1x8x64xf32> to vector<8x64xf32>
    %164 = vector.shape_cast %159 : vector<8x64xf32> to vector<1x8x64xf32>
    tpu.vector_store %arg8[%161, %c0_76, %c0_77], %164 {strides = array<i32>} : memref<8x8x64xf32, #tpu.memory_space<vmem>>, vector<1x8x64xf32>,
    %c2_i32 = arith.constant 2 : i32
    %c0_78 = arith.constant 0 : index
    %c0_79 = arith.constant 0 : index
    %165 = vector.load %arg10[%c0_78, %c0_79] : memref<8x128xf32, #tpu.memory_space<vmem>>, vector<8x128xf32>
    %c0_80 = arith.constant 0 : index
    %c0_81 = arith.constant 0 : index
    %166 = vector.load %arg11[%c0_80, %c0_81] : memref<8x128xf32, #tpu.memory_space<vmem>>, vector<8x128xf32>
    %167 = arith.index_cast %c2_i32 : i32 to index
    %c0_82 = arith.constant 0 : index
    %c0_83 = arith.constant 0 : index
    %168 = vector.load %arg9[%167, %c0_82, %c0_83] : memref<8x8x512xf32, #tpu.memory_space<vmem>>, vector<1x8x512xf32>
    %169 = vector.shape_cast %168 : vector<1x8x512xf32> to vector<8x512xf32>
    %c0_84 = arith.constant 0 : index
    %c0_85 = arith.constant 0 : index
    %170 = vector.load %arg3[%c0_84, %c0_85] : memref<128x512xf32, #tpu.memory_space<vmem>>, vector<128x512xf32>
    %cst_86 = arith.constant dense<0.000000e+00> : vector<8x512xf32>
    %171 = tpu.matmul %165, %170, %cst_86 {dimension_numbers = #tpu.dot_dimension_numbers<[1], [0], [0], [1], [0, 0, 1, 1], [], []>} : vector<8x128xf32>, vector<128x512xf32>, vector<8x512xf32> -> vector<8x512xf32>
    %172 = arith.addf %169, %171 : vector<8x512xf32>
    %173 = vector.extract_strided_slice %172 {offsets = [0, 0], sizes = [8, 256], strides = [1, 1]} : vector<8x512xf32> to vector<8x256xf32>
    %174 = arith.negf %173 : vector<8x256xf32>
    %175 = math.exp %174 : vector<8x256xf32>
    %cst_87 = arith.constant 1.000000e+00 : f32
    %176 = vector.broadcast %cst_87 : f32 to vector<8x256xf32>
    %177 = arith.addf %176, %175 : vector<8x256xf32>
    %178 = arith.divf %176, %177 : vector<8x256xf32>
    %179 = vector.extract_strided_slice %172 {offsets = [0, 256], sizes = [8, 128], strides = [1, 1]} : vector<8x512xf32> to vector<8x128xf32>
    %180 = math.tanh %179 : vector<8x128xf32>
    %181 = vector.extract_strided_slice %172 {offsets = [0, 384], sizes = [8, 128], strides = [1, 1]} : vector<8x512xf32> to vector<8x128xf32>
    %182 = arith.negf %181 : vector<8x128xf32>
    %183 = math.exp %182 : vector<8x128xf32>
    %cst_88 = arith.constant 1.000000e+00 : f32
    %184 = vector.broadcast %cst_88 : f32 to vector<8x128xf32>
    %185 = arith.addf %184, %183 : vector<8x128xf32>
    %186 = arith.divf %184, %185 : vector<8x128xf32>
    %187 = vector.extract_strided_slice %178 {offsets = [0, 0], sizes = [8, 128], strides = [1, 1]} : vector<8x256xf32> to vector<8x128xf32>
    %188 = vector.extract_strided_slice %178 {offsets = [0, 128], sizes = [8, 128], strides = [1, 1]} : vector<8x256xf32> to vector<8x128xf32>
    %189 = arith.mulf %188, %166 : vector<8x128xf32>
    %190 = arith.mulf %187, %180 : vector<8x128xf32>
    %191 = arith.addf %189, %190 : vector<8x128xf32>
    %192 = math.tanh %191 : vector<8x128xf32>
    %193 = arith.mulf %186, %192 : vector<8x128xf32>
    %c0_89 = arith.constant 0 : index
    %c0_90 = arith.constant 0 : index
    %194 = vector.load %arg10[%c0_89, %c0_90] : memref<8x128xf32, #tpu.memory_space<vmem>>, vector<8x128xf32>
    tpu.vector_store %arg10[%c0_89, %c0_90], %193 {strides = array<i32>} : memref<8x128xf32, #tpu.memory_space<vmem>>, vector<8x128xf32>,
    %c0_91 = arith.constant 0 : index
    %c0_92 = arith.constant 0 : index
    %195 = vector.load %arg11[%c0_91, %c0_92] : memref<8x128xf32, #tpu.memory_space<vmem>>, vector<8x128xf32>
    tpu.vector_store %arg11[%c0_91, %c0_92], %191 {strides = array<i32>} : memref<8x128xf32, #tpu.memory_space<vmem>>, vector<8x128xf32>,
    %196 = vector.extract_strided_slice %193 {offsets = [0, 0], sizes = [8, 64], strides = [1, 1]} : vector<8x128xf32> to vector<8x64xf32>
    %197 = arith.index_cast %c2_i32 : i32 to index
    %c0_93 = arith.constant 0 : index
    %c0_94 = arith.constant 0 : index
    %198 = vector.load %arg7[%197, %c0_93, %c0_94] : memref<8x8x64xf32, #tpu.memory_space<vmem>>, vector<1x8x64xf32>
    %199 = vector.shape_cast %198 : vector<1x8x64xf32> to vector<8x64xf32>
    %200 = vector.shape_cast %196 : vector<8x64xf32> to vector<1x8x64xf32>
    tpu.vector_store %arg7[%197, %c0_93, %c0_94], %200 {strides = array<i32>} : memref<8x8x64xf32, #tpu.memory_space<vmem>>, vector<1x8x64xf32>,
    %201 = vector.extract_strided_slice %193 {offsets = [0, 64], sizes = [8, 64], strides = [1, 1]} : vector<8x128xf32> to vector<8x64xf32>
    %c7_i32_95 = arith.constant 7 : i32
    %202 = arith.subi %c7_i32_95, %c2_i32 : i32
    %203 = arith.index_cast %202 : i32 to index
    %c0_96 = arith.constant 0 : index
    %c0_97 = arith.constant 0 : index
    %204 = vector.load %arg8[%203, %c0_96, %c0_97] : memref<8x8x64xf32, #tpu.memory_space<vmem>>, vector<1x8x64xf32>
    %205 = vector.shape_cast %204 : vector<1x8x64xf32> to vector<8x64xf32>
    %206 = vector.shape_cast %201 : vector<8x64xf32> to vector<1x8x64xf32>
    tpu.vector_store %arg8[%203, %c0_96, %c0_97], %206 {strides = array<i32>} : memref<8x8x64xf32, #tpu.memory_space<vmem>>, vector<1x8x64xf32>,
    %c3_i32 = arith.constant 3 : i32
    %c0_98 = arith.constant 0 : index
    %c0_99 = arith.constant 0 : index
    %207 = vector.load %arg10[%c0_98, %c0_99] : memref<8x128xf32, #tpu.memory_space<vmem>>, vector<8x128xf32>
    %c0_100 = arith.constant 0 : index
    %c0_101 = arith.constant 0 : index
    %208 = vector.load %arg11[%c0_100, %c0_101] : memref<8x128xf32, #tpu.memory_space<vmem>>, vector<8x128xf32>
    %209 = arith.index_cast %c3_i32 : i32 to index
    %c0_102 = arith.constant 0 : index
    %c0_103 = arith.constant 0 : index
    %210 = vector.load %arg9[%209, %c0_102, %c0_103] : memref<8x8x512xf32, #tpu.memory_space<vmem>>, vector<1x8x512xf32>
    %211 = vector.shape_cast %210 : vector<1x8x512xf32> to vector<8x512xf32>
    %c0_104 = arith.constant 0 : index
    %c0_105 = arith.constant 0 : index
    %212 = vector.load %arg3[%c0_104, %c0_105] : memref<128x512xf32, #tpu.memory_space<vmem>>, vector<128x512xf32>
    %cst_106 = arith.constant dense<0.000000e+00> : vector<8x512xf32>
    %213 = tpu.matmul %207, %212, %cst_106 {dimension_numbers = #tpu.dot_dimension_numbers<[1], [0], [0], [1], [0, 0, 1, 1], [], []>} : vector<8x128xf32>, vector<128x512xf32>, vector<8x512xf32> -> vector<8x512xf32>
    %214 = arith.addf %211, %213 : vector<8x512xf32>
    %215 = vector.extract_strided_slice %214 {offsets = [0, 0], sizes = [8, 256], strides = [1, 1]} : vector<8x512xf32> to vector<8x256xf32>
    %216 = arith.negf %215 : vector<8x256xf32>
    %217 = math.exp %216 : vector<8x256xf32>
    %cst_107 = arith.constant 1.000000e+00 : f32
    %218 = vector.broadcast %cst_107 : f32 to vector<8x256xf32>
    %219 = arith.addf %218, %217 : vector<8x256xf32>
    %220 = arith.divf %218, %219 : vector<8x256xf32>
    %221 = vector.extract_strided_slice %214 {offsets = [0, 256], sizes = [8, 128], strides = [1, 1]} : vector<8x512xf32> to vector<8x128xf32>
    %222 = math.tanh %221 : vector<8x128xf32>
    %223 = vector.extract_strided_slice %214 {offsets = [0, 384], sizes = [8, 128], strides = [1, 1]} : vector<8x512xf32> to vector<8x128xf32>
    %224 = arith.negf %223 : vector<8x128xf32>
    %225 = math.exp %224 : vector<8x128xf32>
    %cst_108 = arith.constant 1.000000e+00 : f32
    %226 = vector.broadcast %cst_108 : f32 to vector<8x128xf32>
    %227 = arith.addf %226, %225 : vector<8x128xf32>
    %228 = arith.divf %226, %227 : vector<8x128xf32>
    %229 = vector.extract_strided_slice %220 {offsets = [0, 0], sizes = [8, 128], strides = [1, 1]} : vector<8x256xf32> to vector<8x128xf32>
    %230 = vector.extract_strided_slice %220 {offsets = [0, 128], sizes = [8, 128], strides = [1, 1]} : vector<8x256xf32> to vector<8x128xf32>
    %231 = arith.mulf %230, %208 : vector<8x128xf32>
    %232 = arith.mulf %229, %222 : vector<8x128xf32>
    %233 = arith.addf %231, %232 : vector<8x128xf32>
    %234 = math.tanh %233 : vector<8x128xf32>
    %235 = arith.mulf %228, %234 : vector<8x128xf32>
    %c0_109 = arith.constant 0 : index
    %c0_110 = arith.constant 0 : index
    %236 = vector.load %arg10[%c0_109, %c0_110] : memref<8x128xf32, #tpu.memory_space<vmem>>, vector<8x128xf32>
    tpu.vector_store %arg10[%c0_109, %c0_110], %235 {strides = array<i32>} : memref<8x128xf32, #tpu.memory_space<vmem>>, vector<8x128xf32>,
    %c0_111 = arith.constant 0 : index
    %c0_112 = arith.constant 0 : index
    %237 = vector.load %arg11[%c0_111, %c0_112] : memref<8x128xf32, #tpu.memory_space<vmem>>, vector<8x128xf32>
    tpu.vector_store %arg11[%c0_111, %c0_112], %233 {strides = array<i32>} : memref<8x128xf32, #tpu.memory_space<vmem>>, vector<8x128xf32>,
    %238 = vector.extract_strided_slice %235 {offsets = [0, 0], sizes = [8, 64], strides = [1, 1]} : vector<8x128xf32> to vector<8x64xf32>
    %239 = arith.index_cast %c3_i32 : i32 to index
    %c0_113 = arith.constant 0 : index
    %c0_114 = arith.constant 0 : index
    %240 = vector.load %arg7[%239, %c0_113, %c0_114] : memref<8x8x64xf32, #tpu.memory_space<vmem>>, vector<1x8x64xf32>
    %241 = vector.shape_cast %240 : vector<1x8x64xf32> to vector<8x64xf32>
    %242 = vector.shape_cast %238 : vector<8x64xf32> to vector<1x8x64xf32>
    tpu.vector_store %arg7[%239, %c0_113, %c0_114], %242 {strides = array<i32>} : memref<8x8x64xf32, #tpu.memory_space<vmem>>, vector<1x8x64xf32>,
    %243 = vector.extract_strided_slice %235 {offsets = [0, 64], sizes = [8, 64], strides = [1, 1]} : vector<8x128xf32> to vector<8x64xf32>
    %c7_i32_115 = arith.constant 7 : i32
    %244 = arith.subi %c7_i32_115, %c3_i32 : i32
    %245 = arith.index_cast %244 : i32 to index
    %c0_116 = arith.constant 0 : index
    %c0_117 = arith.constant 0 : index
    %246 = vector.load %arg8[%245, %c0_116, %c0_117] : memref<8x8x64xf32, #tpu.memory_space<vmem>>, vector<1x8x64xf32>
    %247 = vector.shape_cast %246 : vector<1x8x64xf32> to vector<8x64xf32>
    %248 = vector.shape_cast %243 : vector<8x64xf32> to vector<1x8x64xf32>
    tpu.vector_store %arg8[%245, %c0_116, %c0_117], %248 {strides = array<i32>} : memref<8x8x64xf32, #tpu.memory_space<vmem>>, vector<1x8x64xf32>,
    %c4_i32 = arith.constant 4 : i32
    %c0_118 = arith.constant 0 : index
    %c0_119 = arith.constant 0 : index
    %249 = vector.load %arg10[%c0_118, %c0_119] : memref<8x128xf32, #tpu.memory_space<vmem>>, vector<8x128xf32>
    %c0_120 = arith.constant 0 : index
    %c0_121 = arith.constant 0 : index
    %250 = vector.load %arg11[%c0_120, %c0_121] : memref<8x128xf32, #tpu.memory_space<vmem>>, vector<8x128xf32>
    %251 = arith.index_cast %c4_i32 : i32 to index
    %c0_122 = arith.constant 0 : index
    %c0_123 = arith.constant 0 : index
    %252 = vector.load %arg9[%251, %c0_122, %c0_123] : memref<8x8x512xf32, #tpu.memory_space<vmem>>, vector<1x8x512xf32>
    %253 = vector.shape_cast %252 : vector<1x8x512xf32> to vector<8x512xf32>
    %c0_124 = arith.constant 0 : index
    %c0_125 = arith.constant 0 : index
    %254 = vector.load %arg3[%c0_124, %c0_125] : memref<128x512xf32, #tpu.memory_space<vmem>>, vector<128x512xf32>
    %cst_126 = arith.constant dense<0.000000e+00> : vector<8x512xf32>
    %255 = tpu.matmul %249, %254, %cst_126 {dimension_numbers = #tpu.dot_dimension_numbers<[1], [0], [0], [1], [0, 0, 1, 1], [], []>} : vector<8x128xf32>, vector<128x512xf32>, vector<8x512xf32> -> vector<8x512xf32>
    %256 = arith.addf %253, %255 : vector<8x512xf32>
    %257 = vector.extract_strided_slice %256 {offsets = [0, 0], sizes = [8, 256], strides = [1, 1]} : vector<8x512xf32> to vector<8x256xf32>
    %258 = arith.negf %257 : vector<8x256xf32>
    %259 = math.exp %258 : vector<8x256xf32>
    %cst_127 = arith.constant 1.000000e+00 : f32
    %260 = vector.broadcast %cst_127 : f32 to vector<8x256xf32>
    %261 = arith.addf %260, %259 : vector<8x256xf32>
    %262 = arith.divf %260, %261 : vector<8x256xf32>
    %263 = vector.extract_strided_slice %256 {offsets = [0, 256], sizes = [8, 128], strides = [1, 1]} : vector<8x512xf32> to vector<8x128xf32>
    %264 = math.tanh %263 : vector<8x128xf32>
    %265 = vector.extract_strided_slice %256 {offsets = [0, 384], sizes = [8, 128], strides = [1, 1]} : vector<8x512xf32> to vector<8x128xf32>
    %266 = arith.negf %265 : vector<8x128xf32>
    %267 = math.exp %266 : vector<8x128xf32>
    %cst_128 = arith.constant 1.000000e+00 : f32
    %268 = vector.broadcast %cst_128 : f32 to vector<8x128xf32>
    %269 = arith.addf %268, %267 : vector<8x128xf32>
    %270 = arith.divf %268, %269 : vector<8x128xf32>
    %271 = vector.extract_strided_slice %262 {offsets = [0, 0], sizes = [8, 128], strides = [1, 1]} : vector<8x256xf32> to vector<8x128xf32>
    %272 = vector.extract_strided_slice %262 {offsets = [0, 128], sizes = [8, 128], strides = [1, 1]} : vector<8x256xf32> to vector<8x128xf32>
    %273 = arith.mulf %272, %250 : vector<8x128xf32>
    %274 = arith.mulf %271, %264 : vector<8x128xf32>
    %275 = arith.addf %273, %274 : vector<8x128xf32>
    %276 = math.tanh %275 : vector<8x128xf32>
    %277 = arith.mulf %270, %276 : vector<8x128xf32>
    %c0_129 = arith.constant 0 : index
    %c0_130 = arith.constant 0 : index
    %278 = vector.load %arg10[%c0_129, %c0_130] : memref<8x128xf32, #tpu.memory_space<vmem>>, vector<8x128xf32>
    tpu.vector_store %arg10[%c0_129, %c0_130], %277 {strides = array<i32>} : memref<8x128xf32, #tpu.memory_space<vmem>>, vector<8x128xf32>,
    %c0_131 = arith.constant 0 : index
    %c0_132 = arith.constant 0 : index
    %279 = vector.load %arg11[%c0_131, %c0_132] : memref<8x128xf32, #tpu.memory_space<vmem>>, vector<8x128xf32>
    tpu.vector_store %arg11[%c0_131, %c0_132], %275 {strides = array<i32>} : memref<8x128xf32, #tpu.memory_space<vmem>>, vector<8x128xf32>,
    %280 = vector.extract_strided_slice %277 {offsets = [0, 0], sizes = [8, 64], strides = [1, 1]} : vector<8x128xf32> to vector<8x64xf32>
    %281 = arith.index_cast %c4_i32 : i32 to index
    %c0_133 = arith.constant 0 : index
    %c0_134 = arith.constant 0 : index
    %282 = vector.load %arg7[%281, %c0_133, %c0_134] : memref<8x8x64xf32, #tpu.memory_space<vmem>>, vector<1x8x64xf32>
    %283 = vector.shape_cast %282 : vector<1x8x64xf32> to vector<8x64xf32>
    %284 = vector.shape_cast %280 : vector<8x64xf32> to vector<1x8x64xf32>
    tpu.vector_store %arg7[%281, %c0_133, %c0_134], %284 {strides = array<i32>} : memref<8x8x64xf32, #tpu.memory_space<vmem>>, vector<1x8x64xf32>,
    %285 = vector.extract_strided_slice %277 {offsets = [0, 64], sizes = [8, 64], strides = [1, 1]} : vector<8x128xf32> to vector<8x64xf32>
    %c7_i32_135 = arith.constant 7 : i32
    %286 = arith.subi %c7_i32_135, %c4_i32 : i32
    %287 = arith.index_cast %286 : i32 to index
    %c0_136 = arith.constant 0 : index
    %c0_137 = arith.constant 0 : index
    %288 = vector.load %arg8[%287, %c0_136, %c0_137] : memref<8x8x64xf32, #tpu.memory_space<vmem>>, vector<1x8x64xf32>
    %289 = vector.shape_cast %288 : vector<1x8x64xf32> to vector<8x64xf32>
    %290 = vector.shape_cast %285 : vector<8x64xf32> to vector<1x8x64xf32>
    tpu.vector_store %arg8[%287, %c0_136, %c0_137], %290 {strides = array<i32>} : memref<8x8x64xf32, #tpu.memory_space<vmem>>, vector<1x8x64xf32>,
    %c5_i32 = arith.constant 5 : i32
    %c0_138 = arith.constant 0 : index
    %c0_139 = arith.constant 0 : index
    %291 = vector.load %arg10[%c0_138, %c0_139] : memref<8x128xf32, #tpu.memory_space<vmem>>, vector<8x128xf32>
    %c0_140 = arith.constant 0 : index
    %c0_141 = arith.constant 0 : index
    %292 = vector.load %arg11[%c0_140, %c0_141] : memref<8x128xf32, #tpu.memory_space<vmem>>, vector<8x128xf32>
    %293 = arith.index_cast %c5_i32 : i32 to index
    %c0_142 = arith.constant 0 : index
    %c0_143 = arith.constant 0 : index
    %294 = vector.load %arg9[%293, %c0_142, %c0_143] : memref<8x8x512xf32, #tpu.memory_space<vmem>>, vector<1x8x512xf32>
    %295 = vector.shape_cast %294 : vector<1x8x512xf32> to vector<8x512xf32>
    %c0_144 = arith.constant 0 : index
    %c0_145 = arith.constant 0 : index
    %296 = vector.load %arg3[%c0_144, %c0_145] : memref<128x512xf32, #tpu.memory_space<vmem>>, vector<128x512xf32>
    %cst_146 = arith.constant dense<0.000000e+00> : vector<8x512xf32>
    %297 = tpu.matmul %291, %296, %cst_146 {dimension_numbers = #tpu.dot_dimension_numbers<[1], [0], [0], [1], [0, 0, 1, 1], [], []>} : vector<8x128xf32>, vector<128x512xf32>, vector<8x512xf32> -> vector<8x512xf32>
    %298 = arith.addf %295, %297 : vector<8x512xf32>
    %299 = vector.extract_strided_slice %298 {offsets = [0, 0], sizes = [8, 256], strides = [1, 1]} : vector<8x512xf32> to vector<8x256xf32>
    %300 = arith.negf %299 : vector<8x256xf32>
    %301 = math.exp %300 : vector<8x256xf32>
    %cst_147 = arith.constant 1.000000e+00 : f32
    %302 = vector.broadcast %cst_147 : f32 to vector<8x256xf32>
    %303 = arith.addf %302, %301 : vector<8x256xf32>
    %304 = arith.divf %302, %303 : vector<8x256xf32>
    %305 = vector.extract_strided_slice %298 {offsets = [0, 256], sizes = [8, 128], strides = [1, 1]} : vector<8x512xf32> to vector<8x128xf32>
    %306 = math.tanh %305 : vector<8x128xf32>
    %307 = vector.extract_strided_slice %298 {offsets = [0, 384], sizes = [8, 128], strides = [1, 1]} : vector<8x512xf32> to vector<8x128xf32>
    %308 = arith.negf %307 : vector<8x128xf32>
    %309 = math.exp %308 : vector<8x128xf32>
    %cst_148 = arith.constant 1.000000e+00 : f32
    %310 = vector.broadcast %cst_148 : f32 to vector<8x128xf32>
    %311 = arith.addf %310, %309 : vector<8x128xf32>
    %312 = arith.divf %310, %311 : vector<8x128xf32>
    %313 = vector.extract_strided_slice %304 {offsets = [0, 0], sizes = [8, 128], strides = [1, 1]} : vector<8x256xf32> to vector<8x128xf32>
    %314 = vector.extract_strided_slice %304 {offsets = [0, 128], sizes = [8, 128], strides = [1, 1]} : vector<8x256xf32> to vector<8x128xf32>
    %315 = arith.mulf %314, %292 : vector<8x128xf32>
    %316 = arith.mulf %313, %306 : vector<8x128xf32>
    %317 = arith.addf %315, %316 : vector<8x128xf32>
    %318 = math.tanh %317 : vector<8x128xf32>
    %319 = arith.mulf %312, %318 : vector<8x128xf32>
    %c0_149 = arith.constant 0 : index
    %c0_150 = arith.constant 0 : index
    %320 = vector.load %arg10[%c0_149, %c0_150] : memref<8x128xf32, #tpu.memory_space<vmem>>, vector<8x128xf32>
    tpu.vector_store %arg10[%c0_149, %c0_150], %319 {strides = array<i32>} : memref<8x128xf32, #tpu.memory_space<vmem>>, vector<8x128xf32>,
    %c0_151 = arith.constant 0 : index
    %c0_152 = arith.constant 0 : index
    %321 = vector.load %arg11[%c0_151, %c0_152] : memref<8x128xf32, #tpu.memory_space<vmem>>, vector<8x128xf32>
    tpu.vector_store %arg11[%c0_151, %c0_152], %317 {strides = array<i32>} : memref<8x128xf32, #tpu.memory_space<vmem>>, vector<8x128xf32>,
    %322 = vector.extract_strided_slice %319 {offsets = [0, 0], sizes = [8, 64], strides = [1, 1]} : vector<8x128xf32> to vector<8x64xf32>
    %323 = arith.index_cast %c5_i32 : i32 to index
    %c0_153 = arith.constant 0 : index
    %c0_154 = arith.constant 0 : index
    %324 = vector.load %arg7[%323, %c0_153, %c0_154] : memref<8x8x64xf32, #tpu.memory_space<vmem>>, vector<1x8x64xf32>
    %325 = vector.shape_cast %324 : vector<1x8x64xf32> to vector<8x64xf32>
    %326 = vector.shape_cast %322 : vector<8x64xf32> to vector<1x8x64xf32>
    tpu.vector_store %arg7[%323, %c0_153, %c0_154], %326 {strides = array<i32>} : memref<8x8x64xf32, #tpu.memory_space<vmem>>, vector<1x8x64xf32>,
    %327 = vector.extract_strided_slice %319 {offsets = [0, 64], sizes = [8, 64], strides = [1, 1]} : vector<8x128xf32> to vector<8x64xf32>
    %c7_i32_155 = arith.constant 7 : i32
    %328 = arith.subi %c7_i32_155, %c5_i32 : i32
    %329 = arith.index_cast %328 : i32 to index
    %c0_156 = arith.constant 0 : index
    %c0_157 = arith.constant 0 : index
    %330 = vector.load %arg8[%329, %c0_156, %c0_157] : memref<8x8x64xf32, #tpu.memory_space<vmem>>, vector<1x8x64xf32>
    %331 = vector.shape_cast %330 : vector<1x8x64xf32> to vector<8x64xf32>
    %332 = vector.shape_cast %327 : vector<8x64xf32> to vector<1x8x64xf32>
    tpu.vector_store %arg8[%329, %c0_156, %c0_157], %332 {strides = array<i32>} : memref<8x8x64xf32, #tpu.memory_space<vmem>>, vector<1x8x64xf32>,
    %c6_i32 = arith.constant 6 : i32
    %c0_158 = arith.constant 0 : index
    %c0_159 = arith.constant 0 : index
    %333 = vector.load %arg10[%c0_158, %c0_159] : memref<8x128xf32, #tpu.memory_space<vmem>>, vector<8x128xf32>
    %c0_160 = arith.constant 0 : index
    %c0_161 = arith.constant 0 : index
    %334 = vector.load %arg11[%c0_160, %c0_161] : memref<8x128xf32, #tpu.memory_space<vmem>>, vector<8x128xf32>
    %335 = arith.index_cast %c6_i32 : i32 to index
    %c0_162 = arith.constant 0 : index
    %c0_163 = arith.constant 0 : index
    %336 = vector.load %arg9[%335, %c0_162, %c0_163] : memref<8x8x512xf32, #tpu.memory_space<vmem>>, vector<1x8x512xf32>
    %337 = vector.shape_cast %336 : vector<1x8x512xf32> to vector<8x512xf32>
    %c0_164 = arith.constant 0 : index
    %c0_165 = arith.constant 0 : index
    %338 = vector.load %arg3[%c0_164, %c0_165] : memref<128x512xf32, #tpu.memory_space<vmem>>, vector<128x512xf32>
    %cst_166 = arith.constant dense<0.000000e+00> : vector<8x512xf32>
    %339 = tpu.matmul %333, %338, %cst_166 {dimension_numbers = #tpu.dot_dimension_numbers<[1], [0], [0], [1], [0, 0, 1, 1], [], []>} : vector<8x128xf32>, vector<128x512xf32>, vector<8x512xf32> -> vector<8x512xf32>
    %340 = arith.addf %337, %339 : vector<8x512xf32>
    %341 = vector.extract_strided_slice %340 {offsets = [0, 0], sizes = [8, 256], strides = [1, 1]} : vector<8x512xf32> to vector<8x256xf32>
    %342 = arith.negf %341 : vector<8x256xf32>
    %343 = math.exp %342 : vector<8x256xf32>
    %cst_167 = arith.constant 1.000000e+00 : f32
    %344 = vector.broadcast %cst_167 : f32 to vector<8x256xf32>
    %345 = arith.addf %344, %343 : vector<8x256xf32>
    %346 = arith.divf %344, %345 : vector<8x256xf32>
    %347 = vector.extract_strided_slice %340 {offsets = [0, 256], sizes = [8, 128], strides = [1, 1]} : vector<8x512xf32> to vector<8x128xf32>
    %348 = math.tanh %347 : vector<8x128xf32>
    %349 = vector.extract_strided_slice %340 {offsets = [0, 384], sizes = [8, 128], strides = [1, 1]} : vector<8x512xf32> to vector<8x128xf32>
    %350 = arith.negf %349 : vector<8x128xf32>
    %351 = math.exp %350 : vector<8x128xf32>
    %cst_168 = arith.constant 1.000000e+00 : f32
    %352 = vector.broadcast %cst_168 : f32 to vector<8x128xf32>
    %353 = arith.addf %352, %351 : vector<8x128xf32>
    %354 = arith.divf %352, %353 : vector<8x128xf32>
    %355 = vector.extract_strided_slice %346 {offsets = [0, 0], sizes = [8, 128], strides = [1, 1]} : vector<8x256xf32> to vector<8x128xf32>
    %356 = vector.extract_strided_slice %346 {offsets = [0, 128], sizes = [8, 128], strides = [1, 1]} : vector<8x256xf32> to vector<8x128xf32>
    %357 = arith.mulf %356, %334 : vector<8x128xf32>
    %358 = arith.mulf %355, %348 : vector<8x128xf32>
    %359 = arith.addf %357, %358 : vector<8x128xf32>
    %360 = math.tanh %359 : vector<8x128xf32>
    %361 = arith.mulf %354, %360 : vector<8x128xf32>
    %c0_169 = arith.constant 0 : index
    %c0_170 = arith.constant 0 : index
    %362 = vector.load %arg10[%c0_169, %c0_170] : memref<8x128xf32, #tpu.memory_space<vmem>>, vector<8x128xf32>
    tpu.vector_store %arg10[%c0_169, %c0_170], %361 {strides = array<i32>} : memref<8x128xf32, #tpu.memory_space<vmem>>, vector<8x128xf32>,
    %c0_171 = arith.constant 0 : index
    %c0_172 = arith.constant 0 : index
    %363 = vector.load %arg11[%c0_171, %c0_172] : memref<8x128xf32, #tpu.memory_space<vmem>>, vector<8x128xf32>
    tpu.vector_store %arg11[%c0_171, %c0_172], %359 {strides = array<i32>} : memref<8x128xf32, #tpu.memory_space<vmem>>, vector<8x128xf32>,
    %364 = vector.extract_strided_slice %361 {offsets = [0, 0], sizes = [8, 64], strides = [1, 1]} : vector<8x128xf32> to vector<8x64xf32>
    %365 = arith.index_cast %c6_i32 : i32 to index
    %c0_173 = arith.constant 0 : index
    %c0_174 = arith.constant 0 : index
    %366 = vector.load %arg7[%365, %c0_173, %c0_174] : memref<8x8x64xf32, #tpu.memory_space<vmem>>, vector<1x8x64xf32>
    %367 = vector.shape_cast %366 : vector<1x8x64xf32> to vector<8x64xf32>
    %368 = vector.shape_cast %364 : vector<8x64xf32> to vector<1x8x64xf32>
    tpu.vector_store %arg7[%365, %c0_173, %c0_174], %368 {strides = array<i32>} : memref<8x8x64xf32, #tpu.memory_space<vmem>>, vector<1x8x64xf32>,
    %369 = vector.extract_strided_slice %361 {offsets = [0, 64], sizes = [8, 64], strides = [1, 1]} : vector<8x128xf32> to vector<8x64xf32>
    %c7_i32_175 = arith.constant 7 : i32
    %370 = arith.subi %c7_i32_175, %c6_i32 : i32
    %371 = arith.index_cast %370 : i32 to index
    %c0_176 = arith.constant 0 : index
    %c0_177 = arith.constant 0 : index
    %372 = vector.load %arg8[%371, %c0_176, %c0_177] : memref<8x8x64xf32, #tpu.memory_space<vmem>>, vector<1x8x64xf32>
    %373 = vector.shape_cast %372 : vector<1x8x64xf32> to vector<8x64xf32>
    %374 = vector.shape_cast %369 : vector<8x64xf32> to vector<1x8x64xf32>
    tpu.vector_store %arg8[%371, %c0_176, %c0_177], %374 {strides = array<i32>} : memref<8x8x64xf32, #tpu.memory_space<vmem>>, vector<1x8x64xf32>,
    %c7_i32_178 = arith.constant 7 : i32
    %c0_179 = arith.constant 0 : index
    %c0_180 = arith.constant 0 : index
    %375 = vector.load %arg10[%c0_179, %c0_180] : memref<8x128xf32, #tpu.memory_space<vmem>>, vector<8x128xf32>
    %c0_181 = arith.constant 0 : index
    %c0_182 = arith.constant 0 : index
    %376 = vector.load %arg11[%c0_181, %c0_182] : memref<8x128xf32, #tpu.memory_space<vmem>>, vector<8x128xf32>
    %377 = arith.index_cast %c7_i32_178 : i32 to index
    %c0_183 = arith.constant 0 : index
    %c0_184 = arith.constant 0 : index
    %378 = vector.load %arg9[%377, %c0_183, %c0_184] : memref<8x8x512xf32, #tpu.memory_space<vmem>>, vector<1x8x512xf32>
    %379 = vector.shape_cast %378 : vector<1x8x512xf32> to vector<8x512xf32>
    %c0_185 = arith.constant 0 : index
    %c0_186 = arith.constant 0 : index
    %380 = vector.load %arg3[%c0_185, %c0_186] : memref<128x512xf32, #tpu.memory_space<vmem>>, vector<128x512xf32>
    %cst_187 = arith.constant dense<0.000000e+00> : vector<8x512xf32>
    %381 = tpu.matmul %375, %380, %cst_187 {dimension_numbers = #tpu.dot_dimension_numbers<[1], [0], [0], [1], [0, 0, 1, 1], [], []>} : vector<8x128xf32>, vector<128x512xf32>, vector<8x512xf32> -> vector<8x512xf32>
    %382 = arith.addf %379, %381 : vector<8x512xf32>
    %383 = vector.extract_strided_slice %382 {offsets = [0, 0], sizes = [8, 256], strides = [1, 1]} : vector<8x512xf32> to vector<8x256xf32>
    %384 = arith.negf %383 : vector<8x256xf32>
    %385 = math.exp %384 : vector<8x256xf32>
    %cst_188 = arith.constant 1.000000e+00 : f32
    %386 = vector.broadcast %cst_188 : f32 to vector<8x256xf32>
    %387 = arith.addf %386, %385 : vector<8x256xf32>
    %388 = arith.divf %386, %387 : vector<8x256xf32>
    %389 = vector.extract_strided_slice %382 {offsets = [0, 256], sizes = [8, 128], strides = [1, 1]} : vector<8x512xf32> to vector<8x128xf32>
    %390 = math.tanh %389 : vector<8x128xf32>
    %391 = vector.extract_strided_slice %382 {offsets = [0, 384], sizes = [8, 128], strides = [1, 1]} : vector<8x512xf32> to vector<8x128xf32>
    %392 = arith.negf %391 : vector<8x128xf32>
    %393 = math.exp %392 : vector<8x128xf32>
    %cst_189 = arith.constant 1.000000e+00 : f32
    %394 = vector.broadcast %cst_189 : f32 to vector<8x128xf32>
    %395 = arith.addf %394, %393 : vector<8x128xf32>
    %396 = arith.divf %394, %395 : vector<8x128xf32>
    %397 = vector.extract_strided_slice %388 {offsets = [0, 0], sizes = [8, 128], strides = [1, 1]} : vector<8x256xf32> to vector<8x128xf32>
    %398 = vector.extract_strided_slice %388 {offsets = [0, 128], sizes = [8, 128], strides = [1, 1]} : vector<8x256xf32> to vector<8x128xf32>
    %399 = arith.mulf %398, %376 : vector<8x128xf32>
    %400 = arith.mulf %397, %390 : vector<8x128xf32>
    %401 = arith.addf %399, %400 : vector<8x128xf32>
    %402 = math.tanh %401 : vector<8x128xf32>
    %403 = arith.mulf %396, %402 : vector<8x128xf32>
    %c0_190 = arith.constant 0 : index
    %c0_191 = arith.constant 0 : index
    %404 = vector.load %arg10[%c0_190, %c0_191] : memref<8x128xf32, #tpu.memory_space<vmem>>, vector<8x128xf32>
    tpu.vector_store %arg10[%c0_190, %c0_191], %403 {strides = array<i32>} : memref<8x128xf32, #tpu.memory_space<vmem>>, vector<8x128xf32>,
    %c0_192 = arith.constant 0 : index
    %c0_193 = arith.constant 0 : index
    %405 = vector.load %arg11[%c0_192, %c0_193] : memref<8x128xf32, #tpu.memory_space<vmem>>, vector<8x128xf32>
    tpu.vector_store %arg11[%c0_192, %c0_193], %401 {strides = array<i32>} : memref<8x128xf32, #tpu.memory_space<vmem>>, vector<8x128xf32>,
    %406 = vector.extract_strided_slice %403 {offsets = [0, 0], sizes = [8, 64], strides = [1, 1]} : vector<8x128xf32> to vector<8x64xf32>
    %407 = arith.index_cast %c7_i32_178 : i32 to index
    %c0_194 = arith.constant 0 : index
    %c0_195 = arith.constant 0 : index
    %408 = vector.load %arg7[%407, %c0_194, %c0_195] : memref<8x8x64xf32, #tpu.memory_space<vmem>>, vector<1x8x64xf32>
    %409 = vector.shape_cast %408 : vector<1x8x64xf32> to vector<8x64xf32>
    %410 = vector.shape_cast %406 : vector<8x64xf32> to vector<1x8x64xf32>
    tpu.vector_store %arg7[%407, %c0_194, %c0_195], %410 {strides = array<i32>} : memref<8x8x64xf32, #tpu.memory_space<vmem>>, vector<1x8x64xf32>,
    %411 = vector.extract_strided_slice %403 {offsets = [0, 64], sizes = [8, 64], strides = [1, 1]} : vector<8x128xf32> to vector<8x64xf32>
    %c7_i32_196 = arith.constant 7 : i32
    %412 = arith.subi %c7_i32_196, %c7_i32_178 : i32
    %413 = arith.index_cast %412 : i32 to index
    %c0_197 = arith.constant 0 : index
    %c0_198 = arith.constant 0 : index
    %414 = vector.load %arg8[%413, %c0_197, %c0_198] : memref<8x8x64xf32, #tpu.memory_space<vmem>>, vector<1x8x64xf32>
    %415 = vector.shape_cast %414 : vector<1x8x64xf32> to vector<8x64xf32>
    %416 = vector.shape_cast %411 : vector<8x64xf32> to vector<1x8x64xf32>
    tpu.vector_store %arg8[%413, %c0_197, %c0_198], %416 {strides = array<i32>} : memref<8x8x64xf32, #tpu.memory_space<vmem>>, vector<1x8x64xf32>,
    %c8_i32 = arith.constant 8 : i32
    return
  }
}

</mosaic_0001>

<bundles_post_ra>
// kernel: text_bilstm_forward.1
= control target key start
LH: loop header
LB: loop body
LE: loop exit
PB: predicated region body
PF: predicated region fallthrough
CT: control target
= control target key end

     0   :  { %14 = vsyncpa [#allocation6], 0  ;;  %s3588_s27 = smov [#allocation5]   ;;  %s5171_s0 = inlined_call_operand.vmem [shape: f32[64,32], index: 0, kind: input, shape index: {}]   ;;  %s5172_s1 = inlined_call_operand.vmem [shape: f32[64,32], index: 1, kind: input, shape index: {}]   ;;  %s5173_s2 = inlined_call_operand.hbm [shape: f32[64,512], index: 2, kind: input, shape index: {}]   ;;  %s5174_s3 = inlined_call_operand.vmem [shape: f32[128,512], index: 3, kind: input, shape index: {}]   ;;  %s5175_s4 = inlined_call_operand.vmem [shape: f32[1,512], index: 4, kind: input, shape index: {}]   ;;  %s5176_s5 = inlined_call_operand.vmem [shape: f32[8,128], index: 5, kind: input, shape index: {}]   ;;  %s5177_s6 = inlined_call_operand.vmem [shape: f32[8,128], index: 6, kind: input, shape index: {}]   ;;  %s5178_s7 = inlined_call_operand.vmem [shape: f32[8,8,64], index: 7, kind: output, shape index: {0}]   ;;  %s5179_s8 = inlined_call_operand.vmem [shape: f32[8,8,64], index: 8, kind: output, shape index: {1}]  }
   0x1   :  { %s24_s28 = sshll.u32 %s3588_s27, 4  ;;  %s3564_s9 = scalar_lea.hbm %s5173_s2, 4096  ;;  %s25_s28 = int_to_ptr.vmem [resolvable:$true] %s24_s28 }
   0x2   :  { %p3565_p0 = scmp.ne.s32.totalorder %s5173_s2, %s3564_s9  ;;  %p3568_p1 = scmp.lt.u32.totalorder %s3564_s9, %s5173_s2 }
   0x4   :  { %p3570_p2 = pnand %p3568_p1, %p3565_p0 }
   0x6   :  { %3573 = shalt.err (!%p3570_p2)
}
   0x7   :  { %s3574_s14 = scalar_lea.vmem %s25_s28, 4096  ;;  %p3579_p4 = scmp.lt.s32.totalorder %s25_s28, %s25_s28 }
   0x8   :  { %p3575_p3 = scmp.ne.s32.totalorder %s25_s28, %s3574_s14  ;;  %p3580_p5 = scmp.lt.s32.totalorder %s3574_s14, %s3574_s14 }
   0xa   :  { %p3581_p6 = por %p3580_p5, %p3579_p4 }
   0xc   :  { %p3582_p7 = pnand %p3581_p6, %p3575_p3 }
   0xe   :  { %3585 = shalt.err (!%p3582_p7)
}
   0xf   :  { %s3589_s15 = smov 512   ;;  %s3590_s16 = smov 32  }
  0x10   :  { %30 = dma.hbm_to_vmem [thread:$0]  %s5173_s2, 4096, %s25_s28, [#allocation6], %s3589_s15, %s3589_s15, %s3590_s16  }
  0x11   :  { %3586 = dma.done.wait [#allocation6], 4096  }
  0x12   :  { %3587 = vsyncadd [#allocation6], 4294963200  ;;  %v5180_v0 = vmov 0.0   ;;  %v75_v1 = vld [vmem:[#allocation5 + $0x88] sm:$0xff]  ;;  %v77_v3 = vld [vmem:[#allocation5 + $0x98] sm:$0xff]  ;;  %vm90_vm0 = vcmask 261120  }
  0x13   :  { %179 = vmatprep.mubr.f32.mxu0 %v5180_v0  ;;  %292 = vmatprep.mubr.f32.mxu1 %v5180_v0  ;;  %v79_v2 = vld [vmem:[#allocation5 + $0xa8] sm:$0xff]  ;;  %v81_v5 = vld [vmem:[#allocation5 + $0xb8] sm:$0xff]  ;;  %v74_v6 = vld [vmem:[#allocation5 + $0x80] sm:$0xff]  ;;  %vm1019_vm5 = vcmask 523264   ;;  %s3592_s15 = smov 64  }
  0x14   :  { %v2855_v4 = vpack.c.bf16 %v79_v2, %v75_v1  ;;  %v78_v7 = vld [vmem:[#allocation5 + $0xa0] sm:$0xff]  ;;  %v2863_v8 = vpack.c.bf16 %v81_v5, %v77_v3  ;;  %v76_v10 = vld [vmem:[#allocation5 + $0x90] sm:$0xff]  ;;  %v83_v12 = vld [vmem:[#allocation5 + $0xc8] sm:$0xff] }
  0x15   :  { %v2857_v9 = vpack.c.bf16 %v78_v7, %v74_v6  ;;  %v80_v11 = vld [vmem:[#allocation5 + $0xb0] sm:$0xff]  ;;  %v87_v14 = vld [vmem:[#allocation5 + $0xe8] sm:$0xff]  ;;  %v85_v15 = vld [vmem:[#allocation5 + $0xd8] sm:$0xff] }
  0x16   :  { %2856 = vmatprep.subr.bf16.mxu0 %v2855_v4  ;;  %v2865_v13 = vpack.c.bf16 %v80_v11, %v76_v10  ;;  %v89_v16 = vld [vmem:[#allocation5 + $0xf8] sm:$0xff]  ;;  %2864 = vmatprep.subr.bf16.mxu1 %v2863_v8  ;;  %v2859_v17 = vpack.c.bf16 %v87_v14, %v83_v12  ;;  %v82_v19 = vld [vmem:[#allocation5 + $0xc0] sm:$0xff]  ;;  %v84_v21 = vld [vmem:[#allocation5 + $0xd0] sm:$0xff] }
  0x17   :  { %2858 = vmatpush1.bf16.msra.mxu0 %v2857_v9  ;;  %v2867_v18 = vpack.c.bf16 %v89_v16, %v85_v15  ;;  %v86_v20 = vld [vmem:[#allocation5 + $0xe0] sm:$0xff]  ;;  %v88_v23 = vld [vmem:[#allocation5 + $0xf0] sm:$0xff]  ;;  %v51_v24 = vld [vmem:[#allocation5 + $0x8] sm:$0xff] }
  0x18   :  { %2866 = vmatpush1.bf16.msra.mxu1 %v2865_v13  ;;  %v2861_v22 = vpack.c.bf16 %v86_v20, %v82_v19  ;;  %2860 = vmatprep.subr.bf16.mxu0 %v2859_v17  ;;  %v2869_v25 = vpack.c.bf16 %v88_v23, %v84_v21  ;;  %v55_v26 = vld [vmem:[#allocation5 + $0x28] sm:$0xff]  ;;  %v50_v27 = vld [vmem:[#allocation5] sm:$0xff]  ;;  %v53_v32 = vld [vmem:[#allocation5 + $0x18] sm:$0xff] }
  0x19   :  { %2868 = vmatprep.subr.bf16.mxu1 %v2867_v18  ;;  %v54_v28 = vld [vmem:[#allocation5 + $0x20] sm:$0xff]  ;;  %v2871_v29 = vpack.c.bf16 %v55_v26, %v51_v24  ;;  %v57_v33 = vld [vmem:[#allocation5 + $0x38] sm:$0xff]  ;;  %v59_v35 = vld [vmem:[#allocation5 + $0x48] sm:$0xff] }
  0x1a   :  { %v66_v30 = vld [vmem:[%s5172_s1] sm:$0xff]  ;;  %v2873_v31 = vpack.c.bf16 %v54_v28, %v50_v27  ;;  %v2879_v34 = vpack.c.bf16 %v57_v33, %v53_v32  ;;  %v63_v36 = vld [vmem:[#allocation5 + $0x68] sm:$0xff]  ;;  %v52_v37 = vld [vmem:[#allocation5 + $0x10] sm:$0xff] }
  0x1b   :  { %2862 = vmatpush1.bf16.msra.mxu0 %v2861_v22  ;;  %v2875_v38 = vpack.c.bf16 %v63_v36, %v59_v35  ;;  %v56_v39 = vld [vmem:[#allocation5 + $0x30] sm:$0xff]  ;;  %v58_v40 = vld [vmem:[#allocation5 + $0x40] sm:$0xff]  ;;  %v67_v42 = vld [vmem:[%s5172_s1 + $0x8] sm:$0xff] }
  0x1c   :  { %2870 = vmatpush1.bf16.msra.mxu1 %v2869_v25  ;;  %2872 = vmatprep.subr.bf16.mxu0 %v2871_v29  ;;  %v62_v41 = vld [vmem:[#allocation5 + $0x60] sm:$0xff]  ;;  %v2881_v43 = vpack.c.bf16 %v56_v39, %v52_v37  ;;  %v61_v44 = vld [vmem:[#allocation5 + $0x58] sm:$0xff]  ;;  %v60_v46 = vld [vmem:[#allocation5 + $0x50] sm:$0xff] }
  0x1d   :  { %2880 = vmatprep.subr.bf16.mxu1 %v2879_v34  ;;  %v65_v45 = vld [vmem:[#allocation5 + $0x78] sm:$0xff]  ;;  %v2877_v47 = vpack.c.bf16 %v62_v41, %v58_v40  ;;  %v64_v49 = vld [vmem:[#allocation5 + $0x70] sm:$0xff]  ;;  %v784_v50 = vld [vmem:[%s5174_s3 + $0x8] sm:$0xff] }
  0x1e   :  { %2785 = vmatmul.mubr.msk.f32.vlgmr.msra.gmra.mrb[0].mxu0 %vm90_vm0, %v66_v30  ;;  %v2883_v48 = vpack.c.bf16 %v65_v45, %v61_v44  ;;  %v2885_v51 = vpack.c.bf16 %v64_v49, %v60_v46  ;;  %v788_v52 = vld [vmem:[%s5174_s3 + $0x28] sm:$0xff]  ;;  %v786_v53 = vld [vmem:[%s5174_s3 + $0x18] sm:$0xff]  ;;  %v68_v57 = vld [vmem:[%s5172_s1 + $0x10] sm:$0xff] }
  0x1f   :  { %2793 = vmatmul.mubr.msk.f32.vlgmr.msra.gmra.mrb[0].mxu1 %vm90_vm0, %v66_v30  ;;  %2874 = vmatpush1.bf16.msra.mxu0 %v2873_v31  ;;  %v790_v54 = vld [vmem:[%s5174_s3 + $0x38] sm:$0xff]  ;;  %v3675_v55 = vpack.c.bf16 %v788_v52, %v784_v50  ;;  %v70_v59 = vld [vmem:[%s5172_s1 + $0x20] sm:$0xff]  ;;  %v71_v60 = vld [vmem:[%s5172_s1 + $0x28] sm:$0xff] }
  0x20   :  { %185 = vmatprep.mubr.f32.mxu0 %v5180_v0  ;;  %298 = vmatprep.mubr.f32.mxu1 %v5180_v0  ;;  %v3677_v56 = vpack.c.bf16 %v790_v54, %v786_v53  ;;  %v69_v58 = vld [vmem:[%s5172_s1 + $0x18] sm:$0xff]  ;;  %v72_v61 = vld [vmem:[%s5172_s1 + $0x30] sm:$0xff]  ;;  %v783_v63 = vld [vmem:[%s5174_s3] sm:$0xff] }
  0x21   :  { %2876 = vmatprep.subr.bf16.mxu0 %v2875_v38  ;;  %2882 = vmatpush1.bf16.msra.mxu1 %v2881_v43  ;;  %v73_v62 = vld [vmem:[%s5172_s1 + $0x38] sm:$0xff]  ;;  %v787_v1 = vld [vmem:[%s5174_s3 + $0x20] sm:$0xff]  ;;  %v785_v2 = vld [vmem:[%s5174_s3 + $0x10] sm:$0xff] }
  0x22   :  { %2786 = vmatmul.mubr.msk.f32.gmra.mrb[2].mxu0 %vm90_vm0, %v67_v42  ;;  %2884 = vmatprep.subr.bf16.mxu1 %v2883_v48  ;;  %v789_v3 = vld [vmem:[%s5174_s3 + $0x30] sm:$0xff]  ;;  %v792_v4 = vld [vmem:[%s5174_s3 + $0x48] sm:$0xff]  ;;  %v42_v6 = vld [vmem:[%s5171_s0] sm:$0xff]  ;;  %v3746_v7 = vpack.c.bf16 %v787_v1, %v783_v63 }
  0x23   :  { %2794 = vmatmul.mubr.msk.f32.gmra.mrb[2].mxu1 %vm90_vm0, %v67_v42  ;;  %191 = vmatprep.mubr.f32.mxu0 %v5180_v0  ;;  %v796_v5 = vld [vmem:[%s5174_s3 + $0x68] sm:$0xff]  ;;  %v794_v8 = vld [vmem:[%s5174_s3 + $0x58] sm:$0xff]  ;;  %v3755_v10 = vpack.c.bf16 %v789_v3, %v785_v2  ;;  %v791_v11 = vld [vmem:[%s5174_s3 + $0x40] sm:$0xff] }
  0x24   :  { %304 = vmatprep.mubr.f32.mxu1 %v5180_v0  ;;  %2878 = vmatpush1.bf16.msra.mxu0 %v2877_v47  ;;  %v798_v9 = vld [vmem:[%s5174_s3 + $0x78] sm:$0xff]  ;;  %v795_v12 = vld [vmem:[%s5174_s3 + $0x60] sm:$0xff]  ;;  %v3763_v13 = vpack.c.bf16 %v796_v5, %v792_v4  ;;  %v793_v14 = vld [vmem:[%s5174_s3 + $0x50] sm:$0xff] }
  0x25   :  { %2886 = vmatpush1.bf16.msra.mxu1 %v2885_v51  ;;  %2888 = vmatprep.subr.bf16.mxu0 %v3675_v55  ;;  %v797_v15 = vld [vmem:[%s5174_s3 + $0x70] sm:$0xff]  ;;  %v3772_v16 = vpack.c.bf16 %v798_v9, %v794_v8  ;;  %v800_v17 = vld [vmem:[%s5174_s3 + $0x88] sm:$0xff]  ;;  %v3785_v20 = vpack.c.bf16 %v795_v12, %v791_v11  ;;  %v802_v21 = vld [vmem:[%s5174_s3 + $0x98] sm:$0xff] }
  0x26   :  { %2787 = vmatmul.mubr.msk.f32.gmra.mrb[4].mxu0 %vm90_vm0, %v68_v57  ;;  %2920 = vmatprep.subr.bf16.mxu1 %v3677_v56  ;;  %v804_v18 = vld [vmem:[%s5174_s3 + $0xa8] sm:$0xff]  ;;  %v806_v22 = vld [vmem:[%s5174_s3 + $0xb8] sm:$0xff]  ;;  %v3795_v23 = vpack.c.bf16 %v797_v15, %v793_v14  ;;  %v799_v24 = vld [vmem:[%s5174_s3 + $0x80] sm:$0xff] }
  0x27   :  { %2795 = vmatmul.mubr.msk.f32.gmra.mrb[4].mxu1 %vm90_vm0, %v68_v57  ;;  %197 = vmatprep.mubr.f32.mxu0 %v5180_v0  ;;  %v43_v19 = vld [vmem:[%s5171_s0 + $0x8] sm:$0xff]  ;;  %v803_v25 = vld [vmem:[%s5174_s3 + $0xa0] sm:$0xff]  ;;  %v3805_v26 = vpack.c.bf16 %v804_v18, %v800_v17  ;;  %v801_v27 = vld [vmem:[%s5174_s3 + $0x90] sm:$0xff]  ;;  %v3815_v29 = vpack.c.bf16 %v806_v22, %v802_v21 }
  0x28   :  { %310 = vmatprep.mubr.f32.mxu1 %v5180_v0  ;;  %v805_v28 = vld [vmem:[%s5174_s3 + $0xb0] sm:$0xff]  ;;  %v808_v30 = vld [vmem:[%s5174_s3 + $0xc8] sm:$0xff]  ;;  %v3828_v33 = vpack.c.bf16 %v803_v25, %v799_v24  ;;  %v810_v34 = vld [vmem:[%s5174_s3 + $0xd8] sm:$0xff] }
  0x29   :  { %v812_v31 = vld [vmem:[%s5174_s3 + $0xe8] sm:$0xff]  ;;  %v44_v32 = vld [vmem:[%s5171_s0 + $0x10] sm:$0xff]  ;;  %v814_v35 = vld [vmem:[%s5174_s3 + $0xf8] sm:$0xff]  ;;  %v3838_v36 = vpack.c.bf16 %v805_v28, %v801_v27 }
  0x2a   :  { %2788 = vmatmul.mubr.msk.f32.gmra.mrb[6].mxu0 %vm90_vm0, %v69_v58  ;;  %v807_v37 = vld [vmem:[%s5174_s3 + $0xc0] sm:$0xff]  ;;  %v3848_v39 = vpack.c.bf16 %v812_v31, %v808_v30  ;;  %v809_v40 = vld [vmem:[%s5174_s3 + $0xd0] sm:$0xff]  ;;  %v3858_v42 = vpack.c.bf16 %v814_v35, %v810_v34  ;;  %v816_v43 = vld [vmem:[%s5174_s3 + $0x108] sm:$0xff] }
  0x2b   :  { %2796 = vmatmul.mubr.msk.f32.gmra.mrb[6].mxu1 %vm90_vm0, %v69_v58  ;;  %203 = vmatprep.mubr.f32.mxu0 %v5180_v0  ;;  %v811_v38 = vld [vmem:[%s5174_s3 + $0xe0] sm:$0xff]  ;;  %v813_v41 = vld [vmem:[%s5174_s3 + $0xf0] sm:$0xff]  ;;  %v820_v44 = vld [vmem:[%s5174_s3 + $0x128] sm:$0xff] }
  0x2c   :  { %316 = vmatprep.mubr.f32.mxu1 %v5180_v0  ;;  %v45_v45 = vld [vmem:[%s5171_s0 + $0x18] sm:$0xff]  ;;  %v3871_v46 = vpack.c.bf16 %v811_v38, %v807_v37  ;;  %v3881_v49 = vpack.c.bf16 %v813_v41, %v809_v40  ;;  %v815_v50 = vld [vmem:[%s5174_s3 + $0x100] sm:$0xff]  ;;  %v3891_v52 = vpack.c.bf16 %v820_v44, %v816_v43  ;;  %v817_v53 = vld [vmem:[%s5174_s3 + $0x110] sm:$0xff] }
  0x2d   :  { %v818_v47 = vld [vmem:[%s5174_s3 + $0x118] sm:$0xff]  ;;  %v819_v51 = vld [vmem:[%s5174_s3 + $0x120] sm:$0xff]  ;;  %v821_v54 = vld [vmem:[%s5174_s3 + $0x130] sm:$0xff] }
  0x2e   :  { %2789 = vmatmul.mubr.msk.f32.gmra.mrb[8].mxu0 %vm90_vm0, %v70_v59  ;;  %v822_v48 = vld [vmem:[%s5174_s3 + $0x138] sm:$0xff]  ;;  %v824_v58 = vld [vmem:[%s5174_s3 + $0x148] sm:$0xff]  ;;  %v3924_v1 = vpack.c.bf16 %v821_v54, %v817_v53  ;;  %v823_v2 = vld [vmem:[%s5174_s3 + $0x140] sm:$0xff]  ;;  %v593_v53 = vlaneseq }
  0x2f   :  { %2797 = vmatmul.mubr.msk.f32.gmra.mrb[8].mxu1 %vm90_vm0, %v70_v59  ;;  %209 = vmatprep.mubr.f32.mxu0 %v5180_v0  ;;  %v3901_v57 = vpack.c.bf16 %v822_v48, %v818_v47  ;;  %v828_v59 = vld [vmem:[%s5174_s3 + $0x168] sm:$0xff]  ;;  %v830_v63 = vld [vmem:[%s5174_s3 + $0x178] sm:$0xff]  ;;  %v827_v3 = vld [vmem:[%s5174_s3 + $0x160] sm:$0xff] }
  0x30   :  { %322 = vmatprep.mubr.f32.mxu1 %v5180_v0  ;;  %v3934_v4 = vpack.c.bf16 %v828_v59, %v824_v58  ;;  %v825_v5 = vld [vmem:[%s5174_s3 + $0x150] sm:$0xff]  ;;  %v832_v9 = vld [vmem:[%s5174_s3 + $0x188] sm:$0xff]  ;;  %v3957_v14 = vpack.c.bf16 %v827_v3, %v823_v2  ;;  %v834_v15 = vld [vmem:[%s5174_s3 + $0x198] sm:$0xff]  ;;  %v594_v54 = vshrl.u32 %v593_v53, 7 }
  0x31   :  { %v836_v11 = vld [vmem:[%s5174_s3 + $0x1a8] sm:$0xff]  ;;  %v838_v17 = vld [vmem:[%s5174_s3 + $0x1b8] sm:$0xff]  ;;  %v835_v21 = vld [vmem:[%s5174_s3 + $0x1a0] sm:$0xff] }
  0x32   :  { %2790 = vmatmul.mubr.msk.f32.gmra.mrb[10].mxu0 %vm90_vm0, %v71_v60  ;;  %v47_v12 = vld [vmem:[%s5171_s0 + $0x28] sm:$0xff]  ;;  %v3977_v22 = vpack.c.bf16 %v836_v11, %v832_v9  ;;  %v833_v24 = vld [vmem:[%s5174_s3 + $0x190] sm:$0xff]  ;;  %v3987_v27 = vpack.c.bf16 %v838_v17, %v834_v15  ;;  %v842_v34 = vld [vmem:[%s5174_s3 + $0x1d8] sm:$0xff]  ;;  %v595_v58 = vsub.s32 0, %v594_v54 }
  0x33   :  { %2798 = vmatmul.mubr.msk.f32.gmra.mrb[10].mxu1 %vm90_vm0, %v71_v60  ;;  %215 = vmatprep.mubr.f32.mxu0 %v5180_v0  ;;  %v46_v60 = vld [vmem:[%s5171_s0 + $0x20] sm:$0xff]  ;;  %v837_v25 = vld [vmem:[%s5174_s3 + $0x1b0] sm:$0xff]  ;;  %v840_v28 = vld [vmem:[%s5174_s3 + $0x1c8] sm:$0xff] }
  0x34   :  { %328 = vmatprep.mubr.f32.mxu1 %v5180_v0  ;;  %v844_v30 = vld [vmem:[%s5174_s3 + $0x1e8] sm:$0xff]  ;;  %v48_v31 = vld [vmem:[%s5171_s0 + $0x30] sm:$0xff]  ;;  %v846_v35 = vld [vmem:[%s5174_s3 + $0x1f8] sm:$0xff]  ;;  %v4010_v37 = vpack.c.bf16 %v837_v25, %v833_v24 }
  0x35   :  { %v839_v38 = vld [vmem:[%s5174_s3 + $0x1c0] sm:$0xff]  ;;  %v4020_v41 = vpack.c.bf16 %v844_v30, %v840_v28  ;;  %v841_v43 = vld [vmem:[%s5174_s3 + $0x1d0] sm:$0xff]  ;;  %v49_v47 = vld [vmem:[%s5171_s0 + $0x38] sm:$0xff] }
  0x36   :  { %2791 = vmatmul.mubr.msk.f32.gmra.mrb[12].mxu0 %vm90_vm0, %v72_v61  ;;  %v843_v40 = vld [vmem:[%s5174_s3 + $0x1e0] sm:$0xff]  ;;  %v845_v44 = vld [vmem:[%s5174_s3 + $0x1f0] sm:$0xff] }
  0x37   :  { %2799 = vmatmul.mubr.msk.f32.gmra.mrb[12].mxu1 %vm90_vm0, %v72_v61  ;;  %221 = vmatprep.mubr.f32.mxu0 %v5180_v0  ;;  %v3914_v61 = vpack.c.bf16 %v819_v51, %v815_v50  ;;  %v4037_v48 = vpack.c.bf16 %v843_v40, %v839_v38  ;;  %v4041_v50 = vpack.c.bf16 %v845_v44, %v841_v43  ;;  %v773_v51 = vld [vmem:[%s5176_s5] sm:$0xff] }
  0x38   :  { %334 = vmatprep.mubr.f32.mxu1 %v5180_v0 }
  0x3a   :  { %2792 = vmatmul.mubr.msk.f32.gmra.mrb[14].mxu0 %vm90_vm0, %v73_v62 }
  0x3b   :  { %2800 = vmatmul.mubr.msk.f32.gmra.mrb[14].mxu1 %vm90_vm0, %v73_v62  ;;  %429 = vmatprep.mubr.f32.mxu0 %v5180_v0  ;;  %v826_v62 = vld [vmem:[%s5174_s3 + $0x158] sm:$0xff] }
  0x3c   :  { %542 = vmatprep.mubr.f32.mxu1 %v5180_v0  ;;  %v3944_v8 = vpack.c.bf16 %v830_v63, %v826_v62  ;;  %v603_v62 = vsub.s32 2, %v594_v54  ;;  %v599_v63 = vsub.s32 1, %v594_v54 }
  0x3e   :  { %2801 = vmatmul.mubr.msk.f32.vlgmr.msra.gmra.mrb[0].mxu0 %vm90_vm0, %v42_v6 }
  0x3f   :  { %2809 = vmatmul.mubr.msk.f32.vlgmr.msra.gmra.mrb[0].mxu1 %vm90_vm0, %v42_v6  ;;  %2890 = vmatpush1.bf16.msra.mxu0 %v3746_v7  ;;  %v829_v6 = vld [vmem:[%s5174_s3 + $0x170] sm:$0xff] }
  0x40   :  { %2922 = vmatpush1.bf16.msra.mxu1 %v3755_v10  ;;  %435 = vmatprep.mubr.f32.mxu0 %v5180_v0  ;;  %v3967_v18 = vpack.c.bf16 %v829_v6, %v825_v5  ;;  %v607_v5 = vsub.s32 3, %v594_v54 }
  0x41   :  { %548 = vmatprep.mubr.f32.mxu1 %v5180_v0  ;;  %2892 = vmatprep.subr.bf16.mxu0 %v3763_v13 }
  0x42   :  { %2802 = vmatmul.mubr.msk.f32.gmra.mrb[2].mxu0 %vm90_vm0, %v43_v19  ;;  %2924 = vmatprep.subr.bf16.mxu1 %v3772_v16 }
  0x43   :  { %2810 = vmatmul.mubr.msk.f32.gmra.mrb[2].mxu1 %vm90_vm0, %v43_v19  ;;  %2894 = vmatpush1.bf16.msra.mxu0 %v3785_v20  ;;  %v831_v19 = vld [vmem:[%s5174_s3 + $0x180] sm:$0xff] }
  0x44   :  { %2926 = vmatpush1.bf16.msra.mxu1 %v3795_v23  ;;  %441 = vmatprep.mubr.f32.mxu0 %v5180_v0 }
  0x45   :  { %554 = vmatprep.mubr.f32.mxu1 %v5180_v0  ;;  %2896 = vmatprep.subr.bf16.mxu0 %v3805_v26 }
  0x46   :  { %2803 = vmatmul.mubr.msk.f32.gmra.mrb[4].mxu0 %vm90_vm0, %v44_v32  ;;  %2928 = vmatprep.subr.bf16.mxu1 %v3815_v29 }
  0x47   :  { %2811 = vmatmul.mubr.msk.f32.gmra.mrb[4].mxu1 %vm90_vm0, %v44_v32  ;;  %2898 = vmatpush1.bf16.msra.mxu0 %v3828_v33  ;;  %v4000_v32 = vpack.c.bf16 %v835_v21, %v831_v19  ;;  %v4113_v21 = vand.u32 127, %v593_v53 }
  0x48   :  { %2930 = vmatpush1.bf16.msra.mxu1 %v3838_v36  ;;  %447 = vmatprep.mubr.f32.mxu0 %v5180_v0 }
  0x49   :  { %560 = vmatprep.mubr.f32.mxu1 %v5180_v0  ;;  %2900 = vmatprep.subr.bf16.mxu0 %v3848_v39  ;;  %v648_v40 = vadd.s32 256, %v4113_v21  ;;  %v647_v43 = vadd.s32 128, %v4113_v21  ;;  %v649_v53 = vadd.s32 384, %v4113_v21  ;;  %vm698_vm1 = vcmp.lt.s32.totalorder %v4113_v21, 64 }
  0x4a   :  { %2804 = vmatmul.mubr.msk.f32.gmra.mrb[6].mxu0 %vm90_vm0, %v45_v45  ;;  %2932 = vmatprep.subr.bf16.mxu1 %v3858_v42 }
  0x4b   :  { %2812 = vmatmul.mubr.msk.f32.gmra.mrb[6].mxu1 %vm90_vm0, %v45_v45  ;;  %2902 = vmatpush1.bf16.msra.mxu0 %v3871_v46  ;;  %v4030_v45 = vpack.c.bf16 %v846_v35, %v842_v34 }
  0x4c   :  { %2934 = vmatpush1.bf16.msra.mxu1 %v3881_v49  ;;  %453 = vmatprep.mubr.f32.mxu0 %v5180_v0 }
  0x4d   :  { %566 = vmatprep.mubr.f32.mxu1 %v5180_v0  ;;  %2904 = vmatprep.subr.bf16.mxu0 %v3891_v52 }
  0x4e   :  { %2805 = vmatmul.mubr.msk.f32.gmra.mrb[8].mxu0 %vm90_vm0, %v46_v60  ;;  %2936 = vmatprep.subr.bf16.mxu1 %v3901_v57 }
  0x4f   :  { %2813 = vmatmul.mubr.msk.f32.gmra.mrb[8].mxu1 %vm90_vm0, %v46_v60  ;;  %2906 = vmatpush1.bf16.msra.mxu0 %v3914_v61  ;;  %v591_v60 = vld [vmem:[%s5175_s4] sm:$0xf] }
  0x50   :  { %2938 = vmatpush1.bf16.msra.mxu1 %v3924_v1  ;;  %459 = vmatprep.mubr.f32.mxu0 %v5180_v0  ;;  %v4106_v9 = vrot.slane %v591_v60, %v599_v63 }
  0x51   :  { %572 = vmatprep.mubr.f32.mxu1 %v5180_v0  ;;  %2908 = vmatprep.subr.bf16.mxu0 %v3934_v4 }
  0x52   :  { %2806 = vmatmul.mubr.msk.f32.gmra.mrb[10].mxu0 %vm90_vm0, %v47_v12  ;;  %2940 = vmatprep.subr.bf16.mxu1 %v3944_v8 }
  0x53   :  { %2814 = vmatmul.mubr.msk.f32.gmra.mrb[10].mxu1 %vm90_vm0, %v47_v12  ;;  %2910 = vmatpush1.bf16.msra.mxu0 %v3957_v14  ;;  %v4108_v12 = vrot.slane %v591_v60, %v607_v5  ;;  %v668_v5 = vand.u32 127, %v648_v40 }
  0x54   :  { %2942 = vmatpush1.bf16.msra.mxu1 %v3967_v18  ;;  %465 = vmatprep.mubr.f32.mxu0 %v5180_v0 }
  0x55   :  { %578 = vmatprep.mubr.f32.mxu1 %v5180_v0  ;;  %2912 = vmatprep.subr.bf16.mxu0 %v3977_v22  ;;  %vm4149_vm2 = vcmp.lt.s32.totalorder %v668_v5, 64 }
  0x56   :  { %2807 = vmatmul.mubr.msk.f32.gmra.mrb[12].mxu0 %vm90_vm0, %v48_v31  ;;  %2944 = vmatprep.subr.bf16.mxu1 %v3987_v27 }
  0x57   :  { %2815 = vmatmul.mubr.msk.f32.gmra.mrb[12].mxu1 %vm90_vm0, %v48_v31  ;;  %2914 = vmatpush1.bf16.msra.mxu0 %v4000_v32 }
  0x58   :  { %2946 = vmatpush1.bf16.msra.mxu1 %v4010_v37  ;;  %471 = vmatprep.mubr.f32.mxu0 %v5180_v0 }
  0x59   :  { %584 = vmatprep.mubr.f32.mxu1 %v5180_v0  ;;  %2916 = vmatprep.subr.bf16.mxu0 %v4020_v41 }
  0x5a   :  { %2808 = vmatmul.mubr.msk.f32.gmra.mrb[14].mxu0 %vm90_vm0, %v49_v47  ;;  %2948 = vmatprep.subr.bf16.mxu1 %v4030_v45 }
  0x5b   :  { %2816 = vmatmul.mubr.msk.f32.gmra.mrb[14].mxu1 %vm90_vm0, %v49_v47  ;;  %2918 = vmatpush1.bf16.msra.mxu0 %v4037_v48 }
  0x5c   :  { %2950 = vmatpush1.bf16.msra.mxu1 %v4041_v50  ;;  %911 = vmatprep.mubr.f32.mxu0 %v5180_v0 }
  0x5d   :  { %982 = vmatprep.mubr.f32.mxu1 %v5180_v0  ;;  %2952 = vmatprep.subr.bf16.mxu0 %v3675_v55 }
  0x5e   :  { %912 = vmatmul.mubr.f32.vlgmr.msra.gmra.mrb[16].mxu0 %v773_v51  ;;  %2984 = vmatprep.subr.bf16.mxu1 %v3677_v56 }
  0x5f   :  { %983 = vmatmul.mubr.f32.vlgmr.msra.gmra.mrb[16].mxu1 %v773_v51  ;;  %2954 = vmatpush1.bf16.msra.mxu0 %v3746_v7 }
  0x60   :  { %2986 = vmatpush1.bf16.msra.mxu1 %v3755_v10  ;;  %2956 = vmatprep.subr.bf16.mxu0 %v3763_v13 }
  0x61   :  { %2988 = vmatprep.subr.bf16.mxu1 %v3772_v16  ;;  %1161 = vmatprep.mubr.f32.mxu0 %v5180_v0 }
  0x62   :  { %1232 = vmatprep.mubr.f32.mxu1 %v5180_v0 }
  0x63   :  { %2958 = vmatpush1.bf16.msra.mxu0 %v3785_v20 }
  0x64   :  { %2990 = vmatpush1.bf16.msra.mxu1 %v3795_v23  ;;  %2960 = vmatprep.subr.bf16.mxu0 %v3805_v26 }
  0x65   :  { %2992 = vmatprep.subr.bf16.mxu1 %v3815_v29 }
  0x67   :  { %2962 = vmatpush1.bf16.msra.mxu0 %v3828_v33 }
  0x68   :  { %2994 = vmatpush1.bf16.msra.mxu1 %v3838_v36  ;;  %2964 = vmatprep.subr.bf16.mxu0 %v3848_v39 }
  0x69   :  { %2996 = vmatprep.subr.bf16.mxu1 %v3858_v42 }
  0x6b   :  { %2966 = vmatpush1.bf16.msra.mxu0 %v3871_v46 }
  0x6c   :  { %2998 = vmatpush1.bf16.msra.mxu1 %v3881_v49  ;;  %2968 = vmatprep.subr.bf16.mxu0 %v3891_v52 }
  0x6d   :  { %3000 = vmatprep.subr.bf16.mxu1 %v3901_v57 }
  0x6f   :  { %2970 = vmatpush1.bf16.msra.mxu0 %v3914_v61 }
  0x70   :  { %3002 = vmatpush1.bf16.msra.mxu1 %v3924_v1  ;;  %2972 = vmatprep.subr.bf16.mxu0 %v3934_v4 }
  0x71   :  { %3004 = vmatprep.subr.bf16.mxu1 %v3944_v8 }
  0x73   :  { %2974 = vmatpush1.bf16.msra.mxu0 %v3957_v14 }
  0x74   :  { %3006 = vmatpush1.bf16.msra.mxu1 %v3967_v18  ;;  %2976 = vmatprep.subr.bf16.mxu0 %v3977_v22 }
  0x75   :  { %3008 = vmatprep.subr.bf16.mxu1 %v3987_v27 }
  0x77   :  { %2978 = vmatpush1.bf16.msra.mxu0 %v4000_v32 }
  0x78   :  { %3010 = vmatpush1.bf16.msra.mxu1 %v4010_v37  ;;  %2980 = vmatprep.subr.bf16.mxu0 %v4020_v41 }
  0x79   :  { %3012 = vmatprep.subr.bf16.mxu1 %v4030_v45 }
  0x7b   :  { %2982 = vmatpush1.bf16.msra.mxu0 %v4037_v48 }
  0x7c   :  { %3014 = vmatpush1.bf16.msra.mxu1 %v4041_v50  ;;  %3016 = vmatprep.subr.bf16.mxu0 %v3675_v55  ;;  %v4102_v55 = vrot.slane %v591_v60, %v595_v58 }
  0x7d   :  { %3048 = vmatprep.subr.bf16.mxu1 %v3677_v56  ;;  %v4104_v56 = vrot.slane %v591_v60, %v603_v62 }
 0x111   :  { %v4091_v59 = vpop.f32.mrb[0].mxu0 }
 0x112   :  { %v4096_v2 = vpop.f32.mrb[0].mxu1  ;;  %v4098_v3 = vpop.f32.mrb[1].mxu0 }
 0x113   :  { %v4100_v6 = vpop.f32.mrb[1].mxu1 }
 0x115   :  { %v437_v11 = vpop.f32.mrb[2].mxu0 }
 0x116   :  { %v4111_v15 = vadd.f32 %v4102_v55, %v437_v11  ;;  %v550_v17 = vpop.f32.mrb[2].mxu1  ;;  %v439_v19 = vpop.f32.mrb[3].mxu0  ;;  %v661_v11 = vand.u32 127, %v647_v43 }
 0x117   :  { %v4116_v24 = vadd.f32 %v4104_v56, %v550_v17  ;;  %v4119_v25 = vadd.f32 %v4106_v9, %v439_v19  ;;  %v552_v28 = vpop.f32.mrb[3].mxu1 }
 0x118   :  { %v4122_v30 = vadd.f32 %v4108_v12, %v552_v28  ;;  %vm4153_vm3 = vcmp.lt.s32.totalorder %v661_v11, 64 }
 0x119   :  { %5216 = vst [vmem:[#allocation8_spill] sm:$0xff] %v4116_v24  ;;  %5217 = vst [vmem:[#allocation9_spill] sm:$0xff] %v4119_v25  ;;  %v443_v31 = vpop.f32.mrb[4].mxu0 }
 0x11a   :  { %5218 = vst [vmem:[#allocation10_spill] sm:$0xff] %v4122_v30  ;;  %v621_v34 = vadd.f32 %v4102_v55, %v443_v31  ;;  %v556_v35 = vpop.f32.mrb[4].mxu1  ;;  %v445_v38 = vpop.f32.mrb[5].mxu0  ;;  %v675_v31 = vand.u32 127, %v649_v53 }
 0x11b   :  { %v4128_v44 = vadd.f32 %v4104_v56, %v556_v35  ;;  %v4131_v47 = vadd.f32 %v4106_v9, %v445_v38  ;;  %v558_v51 = vpop.f32.mrb[5].mxu1 }
 0x11c   :  { %v4135_v54 = vadd.f32 %v4108_v12, %v558_v51  ;;  %vm4163_vm4 = vcmp.lt.s32.totalorder %v675_v31, 64 }
 0x11d   :  { %5219 = vst [vmem:[#allocation11_spill] sm:$0xff] %v4131_v47  ;;  %v449_v58 = vpop.f32.mrb[6].mxu0 }
 0x11e   :  { %5220 = vst [vmem:[#allocation12_spill] sm:$0xff] %v4135_v54  ;;  %v625_v60 = vadd.f32 %v4102_v55, %v449_v58  ;;  %v562_v62 = vpop.f32.mrb[6].mxu1  ;;  %v451_v63 = vpop.f32.mrb[7].mxu0 }
 0x11f   :  { %v4139_v17 = vadd.f32 %v4104_v56, %v562_v62  ;;  %v4142_v19 = vadd.f32 %v4106_v9, %v451_v63  ;;  %v564_v28 = vpop.f32.mrb[7].mxu1 }
 0x120   :  { %v4145_v35 = vadd.f32 %v4108_v12, %v564_v28 }
 0x121   :  { %5221 = vst [vmem:[#allocation13_spill] sm:$0xff] %v4139_v17  ;;  %5222 = vst [vmem:[#allocation14_spill] sm:$0xff] %v4142_v19  ;;  %v455_v38 = vpop.f32.mrb[8].mxu0 }
 0x122   :  { %5223 = vst [vmem:[#allocation15_spill] sm:$0xff] %v4145_v35  ;;  %v629_v51 = vadd.f32 %v4102_v55, %v455_v38  ;;  %v568_v58 = vpop.f32.mrb[8].mxu1  ;;  %v457_v0 = vpop.f32.mrb[9].mxu0 }
 0x123   :  { %v4158_v53 = vadd.f32 %v4104_v56, %v568_v58  ;;  %v4161_v62 = vadd.f32 %v4106_v9, %v457_v0  ;;  %v570_v63 = vpop.f32.mrb[9].mxu1 }
 0x124   :  { %v4168_v5 = vadd.f32 %v4108_v12, %v570_v63  ;;  %v4172_v11 = vsel %vm698_vm1, %v625_v60, %v629_v51  ;;  %v4176_v38 = vsel %vm698_vm1, %v629_v51, %v625_v60 }
 0x125   :  { %5228 = vst [vmem:[#allocation16_spill] sm:$0xff] %v4158_v53  ;;  %5229 = vst [vmem:[#allocation17_spill] sm:$0xff] %v4161_v62  ;;  %v461_v58 = vpop.f32.mrb[10].mxu0 }
 0x126   :  { %5232 = vst [vmem:[#allocation18_spill] sm:$0xff] %v4168_v5  ;;  %5233 = vst [vmem:[#allocation19_spill] sm:$0xff] %v4172_v11  ;;  %v633_v51 = vadd.f32 %v4102_v55, %v461_v58  ;;  %v463_v11 = vpop.f32.mrb[11].mxu0 }
 0x127   :  { %5234 = vst [vmem:[#allocation20_spill] sm:$0xff] %v4176_v38  ;;  %v574_v38 = vpop.f32.mrb[10].mxu1  ;;  %v4207_v53 = vadd.f32 %v4106_v9, %v463_v11 }
 0x128   :  { %v4204_v63 = vadd.f32 %v4104_v56, %v574_v38  ;;  %v576_v60 = vpop.f32.mrb[11].mxu1  ;;  %v4214_v62 = vsel %vm698_vm1, %v621_v34, %v633_v51  ;;  %v4218_v0 = vsel %vm698_vm1, %v633_v51, %v621_v34 }
 0x129   :  { %5236 = vst [vmem:[#allocation22_spill] sm:$0xff] %v4207_v53  ;;  %v4210_v58 = vadd.f32 %v4108_v12, %v576_v60  ;;  %5238 = vst [vmem:[#allocation24_spill] sm:$0xff] %v4218_v0  ;;  %v467_v19 = vpop.f32.mrb[12].mxu0 }
 0x12a   :  { %5235 = vst [vmem:[#allocation21_spill] sm:$0xff] %v4204_v63  ;;  %v637_v51 = vadd.f32 %v4102_v55, %v467_v19  ;;  %v580_v31 = vpop.f32.mrb[12].mxu1  ;;  %v469_v0 = vpop.f32.mrb[13].mxu0 }
 0x12b   :  { %5237 = vst [vmem:[#allocation23_spill] sm:$0xff] %v4210_v58  ;;  %v4246_v60 = vadd.f32 %v4104_v56, %v580_v31  ;;  %v4249_v5 = vadd.f32 %v4106_v9, %v469_v0  ;;  %v582_v34 = vpop.f32.mrb[13].mxu1  ;;  %v4307_v58 = vadd.f32 %v4108_v12, %v4100_v6 }
 0x12c   :  { %v4252_v19 = vadd.f32 %v4108_v12, %v582_v34  ;;  %v4257_v35 = vsel %vm698_vm1, %v4111_v15, %v637_v51  ;;  %v4262_v38 = vsel %vm698_vm1, %v637_v51, %v4111_v15  ;;  %v613_v51 = vadd.f32 %v4102_v55, %v4091_v59 }
 0x12d   :  { %5239 = vst [vmem:[#allocation25_spill] sm:$0xff] %v4246_v60  ;;  %5240 = vst [vmem:[#allocation26_spill] sm:$0xff] %v4249_v5  ;;  %v473_v11 = vpop.f32.mrb[14].mxu0  ;;  %v4293_v15 = vadd.f32 %v4104_v56, %v4096_v2  ;;  %v4297_v59 = vadd.f32 %v4106_v9, %v4098_v3 }
 0x12e   :  { %5241 = vst [vmem:[#allocation27_spill] sm:$0xff] %v4252_v19  ;;  %5242 = vst [vmem:[#allocation28_spill] sm:$0xff] %v4262_v38  ;;  %v641_v0 = vadd.f32 %v4102_v55, %v473_v11  ;;  %v586_v38 = vpop.f32.mrb[14].mxu1  ;;  %v475_v17 = vpop.f32.mrb[15].mxu0 }
 0x12f   :  { %5243 = vst [vmem:[#allocation29_spill] sm:$0xff] %v4293_v15  ;;  %5244 = vst [vmem:[#allocation30_spill] sm:$0xff] %v4297_v59  ;;  %v4300_v55 = vadd.f32 %v4104_v56, %v586_v38  ;;  %v4303_v11 = vadd.f32 %v4106_v9, %v475_v17  ;;  %v588_v31 = vpop.f32.mrb[15].mxu1 }
 0x130   :  { %5247 = vst [vmem:[#allocation33_spill] sm:$0xff] %v4307_v58  ;;  %v4310_v34 = vadd.f32 %v4108_v12, %v588_v31  ;;  %v702_v2 = vsel %vm698_vm1, %v613_v51, %v641_v0  ;;  %v4316_v3 = vsel %vm698_vm1, %v641_v0, %v613_v51 }
 0x131   :  { %5245 = vst [vmem:[#allocation31_spill] sm:$0xff] %v4300_v55  ;;  %5246 = vst [vmem:[#allocation32_spill] sm:$0xff] %v4303_v11  ;;  %v913_v56 = vpop.f32.mrb[16].mxu0  ;;  %v704_v9 = vsel %vm4149_vm2, %v4293_v15, %v4300_v55  ;;  %v703_v6 = vsel %vm4153_vm3, %v4297_v59, %v4303_v11 }
 0x132   :  { %5248 = vst [vmem:[#allocation34_spill] sm:$0xff] %v4310_v34  ;;  %5249 = vst [vmem:[#allocation35_spill] sm:$0xff] %v4316_v3  ;;  %v989_v17 = vadd.f32 %v913_v56, %v702_v2  ;;  %v984_v38 = vpop.f32.mrb[16].mxu1  ;;  %v915_v0 = vpop.f32.mrb[17].mxu0  ;;  %v705_v31 = vsel %vm4163_vm4, %v4307_v58, %v4310_v34 }
 0x133   :  { %v991_v3 = vadd.f32 %v984_v38, %v704_v9  ;;  %v990_v12 = vadd.f32 %v915_v0, %v703_v6  ;;  %v986_v15 = vpop.f32.mrb[17].mxu1  ;;  %v775_v9 = vld [vmem:[%s5177_s6] sm:$0xff]  ;;  %v1540_v38 = vld [vmem:[%s5174_s3 + $0x38] sm:$0xff] }
 0x134   :  { %v2817_v55 = vmul.f32 -1.442695, %v989_v17  ;;  %v992_v54 = vadd.f32 %v986_v15, %v705_v31  ;;  %v1533_v0 = vld [vmem:[%s5174_s3] sm:$0xff] }
 0x135   :  { %v2818_v53 = vmul.f32 -1.442695, %v990_v12  ;;  %v1537_v31 = vld [vmem:[%s5174_s3 + $0x20] sm:$0xff] }
 0x136   :  { %3436 = vpow2.f32 %v2817_v55  ;;  %v2819_v2 = vmul.f32 -1.442695, %v992_v54 }
 0x137   :  { %3438 = vpow2.f32 %v2818_v53 }
 0x138   :  { %3440 = vpow2.f32 %v2819_v2 }
 0x139   :  { %3442 = vtanh.f32 %v991_v3 }
 0x140   :  { %v3437_v56 = vpop.eup %3436 }
 0x141   :  { %v3439_v21 = vpop.eup %3438  ;;  %v999_v59 = vadd.f32 1.0, %v3437_v56  ;;  %v4438_v56 = vpack.c.bf16 %v1537_v31, %v1533_v0  ;;  %v1572_v0 = vld [vmem:[%s5174_s3 + $0x138] sm:$0xff]  ;;  %v1565_v31 = vld [vmem:[%s5174_s3 + $0x100] sm:$0xff] }
 0x142   :  { %v1000_v11 = vadd.f32 1.0, %v3439_v21  ;;  %v3441_v47 = vpop.eup %3440 }
 0x143   :  { %3444 = vrcp.f32 %v999_v59  ;;  %v3443_v63 = vpop.eup %3442  ;;  %v1009_v55 = vadd.f32 1.0, %v3441_v47  ;;  %v5250_v47 = vmov 0.0  }
 0x144   :  { %3446 = vrcp.f32 %v1000_v11  ;;  %v1536_v11 = vld [vmem:[%s5174_s3 + $0x18] sm:$0xff] }
 0x145   :  { %3448 = vrcp.f32 %v1009_v55  ;;  %v4436_v2 = vpack.c.bf16 %v1540_v38, %v1536_v11  ;;  %v1546_v55 = vld [vmem:[%s5174_s3 + $0x68] sm:$0xff]  ;;  %v1568_v11 = vld [vmem:[%s5174_s3 + $0x118] sm:$0xff] }
 0x14d   :  { %v3445_v6 = vpop.eup %3444 }
 0x14e   :  { %v3447_v15 = vpop.eup %3446  ;;  %v1013_v12 = vmul.f32 %v3445_v6, %v3443_v63  ;;  %v1538_v63 = vld [vmem:[%s5174_s3 + $0x28] sm:$0xff]  ;;  %v1539_v6 = vld [vmem:[%s5174_s3 + $0x30] sm:$0xff] }
 0x14f   :  { %v1012_v53 = vmul.f32 %v3447_v15, %v775_v9  ;;  %v3449_v3 = vpop.eup %3448  ;;  %v1535_v9 = vld [vmem:[%s5174_s3 + $0x10] sm:$0xff] }
 0x150   :  { %v4447_v15 = vpack.c.bf16 %v1539_v6, %v1535_v9  ;;  %v1569_v9 = vld [vmem:[%s5174_s3 + $0x120] sm:$0xff] }
 0x151   :  { %v4345_v54 = vadd.f32 %v1013_v12, %v1012_v53  ;;  %v1542_v12 = vld [vmem:[%s5174_s3 + $0x48] sm:$0xff]  ;;  %v1544_v53 = vld [vmem:[%s5174_s3 + $0x58] sm:$0xff] }
 0x153   :  { %3450 = vtanh.f32 %v4345_v54 }
 0x15d   :  { %v3451_v21 = vpop.eup %3450 }
 0x15e   :  { %v1016_v59 = vmul.f32 %v3451_v21, %v3449_v3  ;;  %v1548_v3 = vld [vmem:[%s5174_s3 + $0x78] sm:$0xff]  ;;  %v1541_v21 = vld [vmem:[%s5174_s3 + $0x40] sm:$0xff] }
 0x160   :  { %1022 = vrot.lane.b32.xlu0 %v1016_v59, %s3592_s15  ;;  %1020 = vst.msk [vmem:[%s5178_s7] sm:$0xff] %vm1019_vm5, %v1016_v59  ;;  %1162 = vmatmul.mubr.f32.vlgmr.msra.gmra.mrb[18].mxu0 %v1016_v59 }
 0x161   :  { %1233 = vmatmul.mubr.f32.vlgmr.msra.gmra.mrb[18].mxu1 %v1016_v59  ;;  %3018 = vmatpush1.bf16.msra.mxu0 %v3746_v7  ;;  %v1545_v59 = vld [vmem:[%s5174_s3 + $0x60] sm:$0xff] }
 0x162   :  { %3050 = vmatpush1.bf16.msra.mxu1 %v3755_v10  ;;  %3020 = vmatprep.subr.bf16.mxu0 %v3763_v13 }
 0x163   :  { %3052 = vmatprep.subr.bf16.mxu1 %v3772_v16  ;;  %1411 = vmatprep.mubr.f32.mxu0 %v5250_v47 }
 0x164   :  { %1482 = vmatprep.mubr.f32.mxu1 %v5250_v47 }
 0x165   :  { %3022 = vmatpush1.bf16.msra.mxu0 %v3785_v20 }
 0x166   :  { %3054 = vmatpush1.bf16.msra.mxu1 %v3795_v23  ;;  %3024 = vmatprep.subr.bf16.mxu0 %v3805_v26  ;;  %v5251_v23 = vsel %vm4149_vm2, %v4116_v24, %v4246_v60 }
 0x167   :  { %3056 = vmatprep.subr.bf16.mxu1 %v3815_v29  ;;  %v5252_v29 = vsel %vm4153_vm3, %v4119_v25, %v4249_v5 }
 0x169   :  { %3026 = vmatpush1.bf16.msra.mxu0 %v3828_v33 }
 0x16a   :  { %3058 = vmatpush1.bf16.msra.mxu1 %v3838_v36  ;;  %3028 = vmatprep.subr.bf16.mxu0 %v3848_v39 }
 0x16b   :  { %3060 = vmatprep.subr.bf16.mxu1 %v3858_v42  ;;  %v5253_v42 = vsel %vm4163_vm4, %v4122_v30, %v4252_v19 }
 0x16d   :  { %3030 = vmatpush1.bf16.msra.mxu0 %v3871_v46 }
 0x16e   :  { %3062 = vmatpush1.bf16.msra.mxu1 %v3881_v49  ;;  %3032 = vmatprep.subr.bf16.mxu0 %v3891_v52 }
 0x16f   :  { %3064 = vmatprep.subr.bf16.mxu1 %v3901_v57 }
 0x171   :  { %3034 = vmatpush1.bf16.msra.mxu0 %v3914_v61 }
 0x172   :  { %3066 = vmatpush1.bf16.msra.mxu1 %v3924_v1  ;;  %3036 = vmatprep.subr.bf16.mxu0 %v3934_v4 }
 0x173   :  { %3068 = vmatprep.subr.bf16.mxu1 %v3944_v8 }
 0x175   :  { %3038 = vmatpush1.bf16.msra.mxu0 %v3957_v14 }
 0x176   :  { %3070 = vmatpush1.bf16.msra.mxu1 %v3967_v18  ;;  %3040 = vmatprep.subr.bf16.mxu0 %v3977_v22 }
 0x177   :  { %3072 = vmatprep.subr.bf16.mxu1 %v3987_v27 }
 0x179   :  { %3042 = vmatpush1.bf16.msra.mxu0 %v4000_v32 }
 0x17a   :  { %3074 = vmatpush1.bf16.msra.mxu1 %v4010_v37  ;;  %3044 = vmatprep.subr.bf16.mxu0 %v4020_v41 }
 0x17b   :  { %3076 = vmatprep.subr.bf16.mxu1 %v4030_v45 }
 0x17d   :  { %3046 = vmatpush1.bf16.msra.mxu0 %v4037_v48 }
 0x17e   :  { %3078 = vmatpush1.bf16.msra.mxu1 %v4041_v50 }
 0x17f   :  { %3112 = vmatprep.subr.bf16.mxu1 %v4436_v2 }
 0x1d2   :  { %v1023_v7 = vpop.permute.xlu0 %1022 }
 0x1d3   :  { %2820 = vst.msk [vmem:[%s5179_s8 + $0x38] sm:$0xff] %vm1019_vm5, %v1023_v7  ;;  %v4472_v7 = vpack.c.bf16 %v1548_v3, %v1544_v53  ;;  %v1567_v53 = vld [vmem:[%s5174_s3 + $0x110] sm:$0xff] }
 0x1d4   :  { %v1571_v3 = vld [vmem:[%s5174_s3 + $0x130] sm:$0xff] }
 0x233   :  { %v1163_v10 = vpop.f32.mrb[18].mxu0 }
 0x234   :  { %v1239_v13 = vadd.f32 %v1163_v10, %v4257_v35  ;;  %v1234_v16 = vpop.f32.mrb[18].mxu1  ;;  %v1165_v20 = vpop.f32.mrb[19].mxu0  ;;  %v1534_v35 = vld [vmem:[%s5174_s3 + $0x8] sm:$0xff]  ;;  %v4474_v10 = vpack.c.bf16 %v1545_v59, %v1541_v21  ;;  %v4595_v21 = vpack.c.bf16 %v1571_v3, %v1567_v53  ;;  %v1592_v3 = vld [vmem:[%s5174_s3 + $0x1d8] sm:$0xff] }
 0x235   :  { %v1241_v26 = vadd.f32 %v1234_v16, %v5251_v23  ;;  %v1240_v33 = vadd.f32 %v1165_v20, %v5252_v29  ;;  %v1236_v36 = vpop.f32.mrb[19].mxu1  ;;  %v4425_v17 = vpack.c.bf16 %v1538_v63, %v1534_v35  ;;  %v1547_v16 = vld [vmem:[%s5174_s3 + $0x70] sm:$0xff]  ;;  %v1550_v23 = vld [vmem:[%s5174_s3 + $0x88] sm:$0xff]  ;;  %v1552_v29 = vld [vmem:[%s5174_s3 + $0x98] sm:$0xff] }
 0x236   :  { %v2821_v39 = vmul.f32 -1.442695, %v1239_v13  ;;  %v1242_v46 = vadd.f32 %v1236_v36, %v5253_v42  ;;  %v1543_v13 = vld [vmem:[%s5174_s3 + $0x50] sm:$0xff]  ;;  %v1556_v36 = vld [vmem:[%s5174_s3 + $0xb8] sm:$0xff]  ;;  %v1553_v42 = vld [vmem:[%s5174_s3 + $0xa0] sm:$0xff] }
 0x237   :  { %v2822_v49 = vmul.f32 -1.442695, %v1240_v33  ;;  %3080 = vmatprep.subr.bf16.mxu0 %v4425_v17  ;;  %v4483_v20 = vpack.c.bf16 %v1547_v16, %v1543_v13  ;;  %v1566_v35 = vld [vmem:[%s5174_s3 + $0x108] sm:$0xff]  ;;  %v1576_v16 = vld [vmem:[%s5174_s3 + $0x158] sm:$0xff] }
 0x238   :  { %3452 = vpow2.f32 %v2821_v39  ;;  %v2823_v52 = vmul.f32 -1.442695, %v1242_v46  ;;  %v1549_v39 = vld [vmem:[%s5174_s3 + $0x80] sm:$0xff]  ;;  %v4508_v46 = vpack.c.bf16 %v1556_v36, %v1552_v29  ;;  %v1570_v63 = vld [vmem:[%s5174_s3 + $0x128] sm:$0xff] }
 0x239   :  { %3454 = vpow2.f32 %v2822_v49  ;;  %v4510_v49 = vpack.c.bf16 %v1553_v42, %v1549_v39  ;;  %v4569_v38 = vpack.c.bf16 %v1570_v63, %v1566_v35  ;;  %v1574_v59 = vld [vmem:[%s5174_s3 + $0x148] sm:$0xff]  ;;  %v1573_v29 = vld [vmem:[%s5174_s3 + $0x140] sm:$0xff]  ;;  %v1583_v63 = vld [vmem:[%s5174_s3 + $0x190] sm:$0xff] }
 0x23a   :  { %3456 = vpow2.f32 %v2823_v52  ;;  %v1551_v52 = vld [vmem:[%s5174_s3 + $0x90] sm:$0xff]  ;;  %v1578_v13 = vld [vmem:[%s5174_s3 + $0x168] sm:$0xff]  ;;  %v1577_v36 = vld [vmem:[%s5174_s3 + $0x160] sm:$0xff] }
 0x23b   :  { %3458 = vtanh.f32 %v1241_v26  ;;  %v1554_v26 = vld [vmem:[%s5174_s3 + $0xa8] sm:$0xff]  ;;  %v4622_v42 = vpack.c.bf16 %v1577_v36, %v1573_v29  ;;  %v1585_v35 = vld [vmem:[%s5174_s3 + $0x1a0] sm:$0xff]  ;;  %v1591_v29 = vld [vmem:[%s5174_s3 + $0x1d0] sm:$0xff] }
 0x23c   :  { %v4497_v33 = vpack.c.bf16 %v1554_v26, %v1550_v23  ;;  %v4608_v23 = vpack.c.bf16 %v1578_v13, %v1574_v59  ;;  %v1580_v26 = vld [vmem:[%s5174_s3 + $0x178] sm:$0xff]  ;;  %v1589_v13 = vld [vmem:[%s5174_s3 + $0x1c0] sm:$0xff]  ;;  %v1595_v36 = vld [vmem:[%s5174_s3 + $0x1f0] sm:$0xff] }
 0x23d   :  { %v4620_v39 = vpack.c.bf16 %v1580_v26, %v1576_v16  ;;  %v1596_v59 = vld [vmem:[%s5174_s3 + $0x1f8] sm:$0xff]  ;;  %v1593_v26 = vld [vmem:[%s5174_s3 + $0x1e0] sm:$0xff] }
 0x23e   :  { %v4687_v16 = vpack.c.bf16 %v1596_v59, %v1592_v3 }
 0x242   :  { %v3453_v57 = vpop.eup %3452 }
 0x243   :  { %v3455_v61 = vpop.eup %3454  ;;  %v1249_v1 = vadd.f32 1.0, %v3453_v57  ;;  %v1555_v57 = vld [vmem:[%s5174_s3 + $0xb0] sm:$0xff] }
 0x244   :  { %v1250_v4 = vadd.f32 1.0, %v3455_v61  ;;  %v3457_v8 = vpop.eup %3456  ;;  %v4519_v61 = vpack.c.bf16 %v1555_v57, %v1551_v52  ;;  %v1575_v52 = vld [vmem:[%s5174_s3 + $0x150] sm:$0xff] }
 0x245   :  { %3460 = vrcp.f32 %v1249_v1  ;;  %v3459_v14 = vpop.eup %3458  ;;  %v1259_v32 = vadd.f32 1.0, %v3457_v8  ;;  %v1558_v1 = vld [vmem:[%s5174_s3 + $0xc8] sm:$0xff]  ;;  %v1560_v8 = vld [vmem:[%s5174_s3 + $0xd8] sm:$0xff]  ;;  %v1579_v57 = vld [vmem:[%s5174_s3 + $0x170] sm:$0xff] }
 0x246   :  { %3462 = vrcp.f32 %v1250_v4  ;;  %v1562_v4 = vld [vmem:[%s5174_s3 + $0xe8] sm:$0xff] }
 0x247   :  { %3464 = vrcp.f32 %v1259_v32 }
 0x24f   :  { %v3461_v18 = vpop.eup %3460 }
 0x250   :  { %v3463_v22 = vpop.eup %3462  ;;  %v1263_v27 = vmul.f32 %v3461_v18, %v3459_v14  ;;  %v4533_v14 = vpack.c.bf16 %v1562_v4, %v1558_v1  ;;  %v1564_v18 = vld [vmem:[%s5174_s3 + $0xf8] sm:$0xff]  ;;  %v1582_v1 = vld [vmem:[%s5174_s3 + $0x188] sm:$0xff]  ;;  %v4634_v4 = vpack.c.bf16 %v1579_v57, %v1575_v52  ;;  %v4699_v52 = vpack.c.bf16 %v1593_v26, %v1589_v13  ;;  %v5259_v26 = vld [vmem:[#allocation12_spill] sm:$0xff] }
 0x251   :  { %v1262_v37 = vmul.f32 %v3463_v22, %v4345_v54  ;;  %v3465_v45 = vpop.eup %3464  ;;  %v4461_v54 = vpack.c.bf16 %v1546_v55, %v1542_v12  ;;  %v1557_v22 = vld [vmem:[%s5174_s3 + $0xc0] sm:$0xff]  ;;  %v4544_v32 = vpack.c.bf16 %v1564_v18, %v1560_v8  ;;  %v4580_v12 = vpack.c.bf16 %v1572_v0, %v1568_v11  ;;  %v1586_v8 = vld [vmem:[%s5174_s3 + $0x1a8] sm:$0xff]  ;;  %v1584_v18 = vld [vmem:[%s5174_s3 + $0x198] sm:$0xff] }
 0x252   :  { %v4582_v55 = vpack.c.bf16 %v1569_v9, %v1565_v31  ;;  %v1587_v0 = vld [vmem:[%s5174_s3 + $0x1b0] sm:$0xff]  ;;  %v1590_v31 = vld [vmem:[%s5174_s3 + $0x1c8] sm:$0xff]  ;;  %v4703_v57 = vpack.c.bf16 %v1595_v36, %v1591_v29 }
 0x253   :  { %v4406_v41 = vadd.f32 %v1263_v27, %v1262_v37  ;;  %v1561_v27 = vld [vmem:[%s5174_s3 + $0xe0] sm:$0xff]  ;;  %v1594_v9 = vld [vmem:[%s5174_s3 + $0x1e8] sm:$0xff] }
 0x254   :  { %v4546_v37 = vpack.c.bf16 %v1561_v27, %v1557_v22  ;;  %v1588_v22 = vld [vmem:[%s5174_s3 + $0x1b8] sm:$0xff]  ;;  %v4646_v27 = vpack.c.bf16 %v1586_v8, %v1582_v1  ;;  %v4675_v53 = vpack.c.bf16 %v1594_v9, %v1590_v31  ;;  %v5257_v31 = vld [vmem:[#allocation22_spill] sm:$0xff] }
 0x255   :  { %3466 = vtanh.f32 %v4406_v41 }
 0x25f   :  { %v3467_v48 = vpop.eup %3466 }
 0x260   :  { %v1266_v50 = vmul.f32 %v3467_v48, %v3465_v45  ;;  %v1559_v45 = vld [vmem:[%s5174_s3 + $0xd0] sm:$0xff] }
 0x261   :  { %v1563_v48 = vld [vmem:[%s5174_s3 + $0xf0] sm:$0xff] }
 0x262   :  { %1272 = vrot.lane.b32.xlu0 %v1266_v50, %s3592_s15  ;;  %2824 = vst.msk [vmem:[%s5178_s7 + $0x8] sm:$0xff] %vm1019_vm5, %v1266_v50  ;;  %1412 = vmatmul.mubr.f32.vlgmr.msra.gmra.mrb[20].mxu0 %v1266_v50 }
 0x263   :  { %1483 = vmatmul.mubr.f32.vlgmr.msra.gmra.mrb[20].mxu1 %v1266_v50  ;;  %1661 = vmatprep.mubr.f32.mxu0 %v5250_v47  ;;  %v4555_v50 = vpack.c.bf16 %v1563_v48, %v1559_v45  ;;  %v4648_v45 = vpack.c.bf16 %v1588_v22, %v1584_v18  ;;  %v1581_v48 = vld [vmem:[%s5174_s3 + $0x180] sm:$0xff] }
 0x264   :  { %1732 = vmatprep.mubr.f32.mxu1 %v5250_v47  ;;  %3082 = vmatpush1.bf16.msra.mxu0 %v4438_v56  ;;  %v4660_v11 = vpack.c.bf16 %v1585_v35, %v1581_v48  ;;  %v5254_v48 = vld [vmem:[#allocation21_spill] sm:$0xff] }
 0x265   :  { %3114 = vmatpush1.bf16.msra.mxu1 %v4447_v15  ;;  %3084 = vmatprep.subr.bf16.mxu0 %v4461_v54  ;;  %v5255_v35 = vsel %vm4149_vm2, %v4128_v44, %v5254_v48 }
 0x266   :  { %3116 = vmatprep.subr.bf16.mxu1 %v4472_v7 }
 0x268   :  { %3086 = vmatpush1.bf16.msra.mxu0 %v4474_v10 }
 0x269   :  { %3118 = vmatpush1.bf16.msra.mxu1 %v4483_v20  ;;  %3088 = vmatprep.subr.bf16.mxu0 %v4497_v33 }
 0x26a   :  { %3120 = vmatprep.subr.bf16.mxu1 %v4508_v46 }
 0x26c   :  { %3090 = vmatpush1.bf16.msra.mxu0 %v4510_v49 }
 0x26d   :  { %3122 = vmatpush1.bf16.msra.mxu1 %v4519_v61  ;;  %3092 = vmatprep.subr.bf16.mxu0 %v4533_v14 }
 0x26e   :  { %3124 = vmatprep.subr.bf16.mxu1 %v4544_v32 }
 0x270   :  { %3094 = vmatpush1.bf16.msra.mxu0 %v4546_v37 }
 0x271   :  { %3126 = vmatpush1.bf16.msra.mxu1 %v4555_v50  ;;  %3096 = vmatprep.subr.bf16.mxu0 %v4569_v38 }
 0x272   :  { %3128 = vmatprep.subr.bf16.mxu1 %v4580_v12 }
 0x274   :  { %3098 = vmatpush1.bf16.msra.mxu0 %v4582_v55 }
 0x275   :  { %3130 = vmatpush1.bf16.msra.mxu1 %v4595_v21  ;;  %3100 = vmatprep.subr.bf16.mxu0 %v4608_v23 }
 0x276   :  { %3132 = vmatprep.subr.bf16.mxu1 %v4620_v39 }
 0x278   :  { %3102 = vmatpush1.bf16.msra.mxu0 %v4622_v42 }
 0x279   :  { %3134 = vmatpush1.bf16.msra.mxu1 %v4634_v4  ;;  %3104 = vmatprep.subr.bf16.mxu0 %v4646_v27 }
 0x27a   :  { %3136 = vmatprep.subr.bf16.mxu1 %v4648_v45 }
 0x27c   :  { %3106 = vmatpush1.bf16.msra.mxu0 %v4660_v11 }
 0x27d   :  { %3108 = vmatprep.subr.bf16.mxu0 %v4675_v53 }
 0x280   :  { %3110 = vmatpush1.bf16.msra.mxu0 %v4699_v52 }
 0x281   :  { %3144 = vmatprep.subr.bf16.mxu0 %v4425_v17 }
 0x2d4   :  { %v1273_v6 = vpop.permute.xlu0 %1272 }
 0x2d5   :  { %2825 = vst.msk [vmem:[%s5179_s8 + $0x30] sm:$0xff] %vm1019_vm5, %v1273_v6  ;;  %v4673_v6 = vpack.c.bf16 %v1587_v0, %v1583_v63  ;;  %v5256_v0 = vld [vmem:[#allocation11_spill] sm:$0xff] }
 0x2d6   :  { %v5258_v9 = vsel %vm4153_vm3, %v5256_v0, %v5257_v31 }
 0x2d7   :  { %3138 = vmatpush1.bf16.msra.mxu1 %v4673_v6 }
 0x2d8   :  { %3140 = vmatprep.subr.bf16.mxu1 %v4687_v16 }
 0x2db   :  { %3142 = vmatpush1.bf16.msra.mxu1 %v4703_v57 }
 0x2dc   :  { %3176 = vmatprep.subr.bf16.mxu1 %v4436_v2 }
 0x335   :  { %v1413_v1 = vpop.f32.mrb[20].mxu0 }
 0x336   :  { %v1489_v8 = vadd.f32 %v1413_v1, %v4214_v62  ;;  %v1484_v18 = vpop.f32.mrb[20].mxu1  ;;  %v1415_v22 = vpop.f32.mrb[21].mxu0  ;;  %v5260_v62 = vld [vmem:[#allocation23_spill] sm:$0xff] }
 0x337   :  { %v1491_v63 = vadd.f32 %v1484_v18, %v5255_v35  ;;  %v1490_v3 = vadd.f32 %v1415_v22, %v5258_v9  ;;  %v1486_v59 = vpop.f32.mrb[21].mxu1  ;;  %v5261_v29 = vsel %vm4163_vm4, %v5259_v26, %v5260_v62 }
 0x338   :  { %v2826_v13 = vmul.f32 -1.442695, %v1489_v8  ;;  %v1492_v36 = vadd.f32 %v1486_v59, %v5261_v29  ;;  %v5263_v29 = vld [vmem:[#allocation13_spill] sm:$0xff] }
 0x339   :  { %v2827_v1 = vmul.f32 -1.442695, %v1490_v3 }
 0x33a   :  { %3468 = vpow2.f32 %v2826_v13  ;;  %v2828_v51 = vmul.f32 -1.442695, %v1492_v36  ;;  %v5264_v36 = vld [vmem:[#allocation16_spill] sm:$0xff] }
 0x33b   :  { %3470 = vpow2.f32 %v2827_v1  ;;  %v5265_v1 = vsel %vm4149_vm2, %v5263_v29, %v5264_v36 }
 0x33c   :  { %3472 = vpow2.f32 %v2828_v51 }
 0x33d   :  { %3474 = vtanh.f32 %v1491_v63 }
 0x344   :  { %v3469_v58 = vpop.eup %3468 }
 0x345   :  { %v3471_v18 = vpop.eup %3470  ;;  %v1499_v35 = vadd.f32 1.0, %v3469_v58 }
 0x346   :  { %v1500_v34 = vadd.f32 1.0, %v3471_v18  ;;  %v3473_v22 = vpop.eup %3472 }
 0x347   :  { %3476 = vrcp.f32 %v1499_v35  ;;  %v3475_v8 = vpop.eup %3474  ;;  %v1509_v25 = vadd.f32 1.0, %v3473_v22  ;;  %v5266_v35 = vld [vmem:[#allocation14_spill] sm:$0xff]  ;;  %v5267_v22 = vld [vmem:[#allocation17_spill] sm:$0xff] }
 0x348   :  { %3478 = vrcp.f32 %v1500_v34 }
 0x349   :  { %3480 = vrcp.f32 %v1509_v25 }
 0x351   :  { %v3477_v9 = vpop.eup %3476 }
 0x352   :  { %v3479_v30 = vpop.eup %3478  ;;  %v1513_v19 = vmul.f32 %v3477_v9, %v3475_v8  ;;  %v5268_v8 = vsel %vm4153_vm3, %v5266_v35, %v5267_v22 }
 0x353   :  { %v1512_v59 = vmul.f32 %v3479_v30, %v4406_v41  ;;  %v3481_v13 = vpop.eup %3480 }
 0x355   :  { %v4727_v3 = vadd.f32 %v1513_v19, %v1512_v59  ;;  %v5262_v19 = vld [vmem:[#allocation19_spill] sm:$0xff] }
 0x357   :  { %3482 = vtanh.f32 %v4727_v3 }
 0x361   :  { %v3483_v58 = vpop.eup %3482 }
 0x362   :  { %v1516_v51 = vmul.f32 %v3483_v58, %v3481_v13  ;;  %v5269_v58 = vld [vmem:[#allocation15_spill] sm:$0xff] }
 0x364   :  { %1522 = vrot.lane.b32.xlu1 %v1516_v51, %s3592_s15  ;;  %2829 = vst.msk [vmem:[%s5178_s7 + $0x10] sm:$0xff] %vm1019_vm5, %v1516_v51  ;;  %1662 = vmatmul.mubr.f32.vlgmr.msra.gmra.mrb[22].mxu0 %v1516_v51 }
 0x365   :  { %1733 = vmatmul.mubr.f32.vlgmr.msra.gmra.mrb[22].mxu1 %v1516_v51  ;;  %3146 = vmatpush1.bf16.msra.mxu0 %v4438_v56  ;;  %v5270_v51 = vld [vmem:[#allocation18_spill] sm:$0xff] }
 0x366   :  { %3178 = vmatpush1.bf16.msra.mxu1 %v4447_v15  ;;  %3148 = vmatprep.subr.bf16.mxu0 %v4461_v54 }
 0x367   :  { %3180 = vmatprep.subr.bf16.mxu1 %v4472_v7  ;;  %1911 = vmatprep.mubr.f32.mxu0 %v5250_v47 }
 0x368   :  { %1982 = vmatprep.mubr.f32.mxu1 %v5250_v47 }
 0x369   :  { %3150 = vmatpush1.bf16.msra.mxu0 %v4474_v10 }
 0x36a   :  { %3182 = vmatpush1.bf16.msra.mxu1 %v4483_v20  ;;  %3152 = vmatprep.subr.bf16.mxu0 %v4497_v33 }
 0x36b   :  { %3184 = vmatprep.subr.bf16.mxu1 %v4508_v46 }
 0x36d   :  { %3154 = vmatpush1.bf16.msra.mxu0 %v4510_v49 }
 0x36e   :  { %3186 = vmatpush1.bf16.msra.mxu1 %v4519_v61  ;;  %3156 = vmatprep.subr.bf16.mxu0 %v4533_v14 }
 0x36f   :  { %3188 = vmatprep.subr.bf16.mxu1 %v4544_v32 }
 0x371   :  { %3158 = vmatpush1.bf16.msra.mxu0 %v4546_v37 }
 0x372   :  { %3190 = vmatpush1.bf16.msra.mxu1 %v4555_v50  ;;  %3160 = vmatprep.subr.bf16.mxu0 %v4569_v38 }
 0x373   :  { %3192 = vmatprep.subr.bf16.mxu1 %v4580_v12 }
 0x375   :  { %3162 = vmatpush1.bf16.msra.mxu0 %v4582_v55 }
 0x376   :  { %3194 = vmatpush1.bf16.msra.mxu1 %v4595_v21  ;;  %3164 = vmatprep.subr.bf16.mxu0 %v4608_v23 }
 0x377   :  { %3196 = vmatprep.subr.bf16.mxu1 %v4620_v39 }
 0x379   :  { %3166 = vmatpush1.bf16.msra.mxu0 %v4622_v42 }
 0x37a   :  { %3198 = vmatpush1.bf16.msra.mxu1 %v4634_v4  ;;  %3168 = vmatprep.subr.bf16.mxu0 %v4646_v27 }
 0x37b   :  { %3200 = vmatprep.subr.bf16.mxu1 %v4648_v45 }
 0x37d   :  { %3170 = vmatpush1.bf16.msra.mxu0 %v4660_v11 }
 0x37e   :  { %3202 = vmatpush1.bf16.msra.mxu1 %v4673_v6  ;;  %3172 = vmatprep.subr.bf16.mxu0 %v4675_v53 }
 0x37f   :  { %3204 = vmatprep.subr.bf16.mxu1 %v4687_v16 }
 0x381   :  { %3174 = vmatpush1.bf16.msra.mxu0 %v4699_v52 }
 0x382   :  { %3206 = vmatpush1.bf16.msra.mxu1 %v4703_v57  ;;  %3208 = vmatprep.subr.bf16.mxu0 %v4425_v17 }
 0x383   :  { %3240 = vmatprep.subr.bf16.mxu1 %v4436_v2 }
 0x3d6   :  { %v1523_v25 = vpop.permute.xlu1 %1522 }
 0x3d7   :  { %2830 = vst.msk [vmem:[%s5179_s8 + $0x28] sm:$0xff] %vm1019_vm5, %v1523_v25  ;;  %v5271_v25 = vsel %vm4163_vm4, %v5269_v58, %v5270_v51 }
 0x437   :  { %v1663_v30 = vpop.f32.mrb[22].mxu0 }
 0x438   :  { %v1739_v34 = vadd.f32 %v1663_v30, %v5262_v19  ;;  %v1734_v41 = vpop.f32.mrb[22].mxu1  ;;  %v1665_v63 = vpop.f32.mrb[23].mxu0 }
 0x439   :  { %v1741_v18 = vadd.f32 %v1734_v41, %v5265_v1  ;;  %v1740_v9 = vadd.f32 %v1665_v63, %v5268_v8  ;;  %v1736_v59 = vpop.f32.mrb[23].mxu1 }
 0x43a   :  { %v2831_v13 = vmul.f32 -1.442695, %v1739_v34  ;;  %v1742_v30 = vadd.f32 %v1736_v59, %v5271_v25  ;;  %v5273_v25 = vsel %vm4149_vm2, %v5264_v36, %v5263_v29 }
 0x43b   :  { %v2832_v19 = vmul.f32 -1.442695, %v1740_v9 }
 0x43c   :  { %3484 = vpow2.f32 %v2831_v13  ;;  %v2833_v5 = vmul.f32 -1.442695, %v1742_v30 }
 0x43d   :  { %3486 = vpow2.f32 %v2832_v19 }
 0x43e   :  { %3488 = vpow2.f32 %v2833_v5 }
 0x43f   :  { %3490 = vtanh.f32 %v1741_v18 }
 0x446   :  { %v3485_v24 = vpop.eup %3484 }
 0x447   :  { %v3487_v41 = vpop.eup %3486  ;;  %v1749_v1 = vadd.f32 1.0, %v3485_v24 }
 0x448   :  { %v1750_v60 = vadd.f32 1.0, %v3487_v41  ;;  %v3489_v63 = vpop.eup %3488 }
 0x449   :  { %3492 = vrcp.f32 %v1749_v1  ;;  %v3491_v34 = vpop.eup %3490  ;;  %v1759_v0 = vadd.f32 1.0, %v3489_v63  ;;  %v5275_v1 = vsel %vm4163_vm4, %v5270_v51, %v5269_v58 }
 0x44a   :  { %3494 = vrcp.f32 %v1750_v60 }
 0x44b   :  { %3496 = vrcp.f32 %v1759_v0 }
 0x453   :  { %v3493_v8 = vpop.eup %3492 }
 0x454   :  { %v3495_v26 = vpop.eup %3494  ;;  %v1763_v62 = vmul.f32 %v3493_v8, %v3491_v34 }
 0x455   :  { %v1762_v59 = vmul.f32 %v3495_v26, %v4727_v3  ;;  %v3497_v13 = vpop.eup %3496  ;;  %v5272_v26 = vld [vmem:[#allocation20_spill] sm:$0xff] }
 0x457   :  { %v4790_v9 = vadd.f32 %v1763_v62, %v1762_v59 }
 0x459   :  { %3498 = vtanh.f32 %v4790_v9 }
 0x463   :  { %v3499_v24 = vpop.eup %3498 }
 0x464   :  { %v1766_v5 = vmul.f32 %v3499_v24, %v3497_v13 }
 0x466   :  { %1772 = vrot.lane.b32.xlu1 %v1766_v5, %s3592_s15  ;;  %2834 = vst.msk [vmem:[%s5178_s7 + $0x18] sm:$0xff] %vm1019_vm5, %v1766_v5  ;;  %1912 = vmatmul.mubr.f32.vlgmr.msra.gmra.mrb[24].mxu0 %v1766_v5 }
 0x467   :  { %1983 = vmatmul.mubr.f32.vlgmr.msra.gmra.mrb[24].mxu1 %v1766_v5  ;;  %3210 = vmatpush1.bf16.msra.mxu0 %v4438_v56 }
 0x468   :  { %3242 = vmatpush1.bf16.msra.mxu1 %v4447_v15  ;;  %3212 = vmatprep.subr.bf16.mxu0 %v4461_v54 }
 0x469   :  { %3244 = vmatprep.subr.bf16.mxu1 %v4472_v7  ;;  %2161 = vmatprep.mubr.f32.mxu0 %v5250_v47 }
 0x46a   :  { %2232 = vmatprep.mubr.f32.mxu1 %v5250_v47 }
 0x46b   :  { %3214 = vmatpush1.bf16.msra.mxu0 %v4474_v10 }
 0x46c   :  { %3246 = vmatpush1.bf16.msra.mxu1 %v4483_v20  ;;  %3216 = vmatprep.subr.bf16.mxu0 %v4497_v33 }
 0x46d   :  { %3248 = vmatprep.subr.bf16.mxu1 %v4508_v46 }
 0x46f   :  { %3218 = vmatpush1.bf16.msra.mxu0 %v4510_v49 }
 0x470   :  { %3250 = vmatpush1.bf16.msra.mxu1 %v4519_v61  ;;  %3220 = vmatprep.subr.bf16.mxu0 %v4533_v14 }
 0x471   :  { %3252 = vmatprep.subr.bf16.mxu1 %v4544_v32 }
 0x473   :  { %3222 = vmatpush1.bf16.msra.mxu0 %v4546_v37 }
 0x474   :  { %3254 = vmatpush1.bf16.msra.mxu1 %v4555_v50  ;;  %3224 = vmatprep.subr.bf16.mxu0 %v4569_v38 }
 0x475   :  { %3256 = vmatprep.subr.bf16.mxu1 %v4580_v12 }
 0x477   :  { %3226 = vmatpush1.bf16.msra.mxu0 %v4582_v55 }
 0x478   :  { %3258 = vmatpush1.bf16.msra.mxu1 %v4595_v21  ;;  %3228 = vmatprep.subr.bf16.mxu0 %v4608_v23 }
 0x479   :  { %3260 = vmatprep.subr.bf16.mxu1 %v4620_v39 }
 0x47b   :  { %3230 = vmatpush1.bf16.msra.mxu0 %v4622_v42 }
 0x47c   :  { %3262 = vmatpush1.bf16.msra.mxu1 %v4634_v4  ;;  %3232 = vmatprep.subr.bf16.mxu0 %v4646_v27 }
 0x47d   :  { %3264 = vmatprep.subr.bf16.mxu1 %v4648_v45 }
 0x47f   :  { %3234 = vmatpush1.bf16.msra.mxu0 %v4660_v11 }
 0x480   :  { %3266 = vmatpush1.bf16.msra.mxu1 %v4673_v6  ;;  %3236 = vmatprep.subr.bf16.mxu0 %v4675_v53 }
 0x481   :  { %3268 = vmatprep.subr.bf16.mxu1 %v4687_v16 }
 0x483   :  { %3238 = vmatpush1.bf16.msra.mxu0 %v4699_v52 }
 0x484   :  { %3270 = vmatpush1.bf16.msra.mxu1 %v4703_v57  ;;  %3272 = vmatprep.subr.bf16.mxu0 %v4425_v17  ;;  %v5274_v17 = vsel %vm4153_vm3, %v5267_v22, %v5266_v35 }
 0x485   :  { %3304 = vmatprep.subr.bf16.mxu1 %v4436_v2 }
 0x4d8   :  { %v1773_v60 = vpop.permute.xlu1 %1772 }
 0x4d9   :  { %2835 = vst.msk [vmem:[%s5179_s8 + $0x20] sm:$0xff] %vm1019_vm5, %v1773_v60 }
 0x539   :  { %v1913_v0 = vpop.f32.mrb[24].mxu0 }
 0x53a   :  { %v1989_v62 = vadd.f32 %v1913_v0, %v5272_v26  ;;  %v1984_v3 = vpop.f32.mrb[24].mxu1  ;;  %v1915_v18 = vpop.f32.mrb[25].mxu0 }
 0x53b   :  { %v1991_v30 = vadd.f32 %v1984_v3, %v5273_v25  ;;  %v1990_v2 = vadd.f32 %v1915_v18, %v5274_v17  ;;  %v1986_v19 = vpop.f32.mrb[25].mxu1  ;;  %v2534_v18 = vld [vmem:[%s5174_s3 + $0x8] sm:$0xff] }
 0x53c   :  { %v2836_v41 = vmul.f32 -1.442695, %v1989_v62  ;;  %v1992_v63 = vadd.f32 %v1986_v19, %v5275_v1  ;;  %v2538_v25 = vld [vmem:[%s5174_s3 + $0x28] sm:$0xff]  ;;  %v2537_v19 = vld [vmem:[%s5174_s3 + $0x20] sm:$0xff] }
 0x53d   :  { %v2837_v34 = vmul.f32 -1.442695, %v1990_v2  ;;  %v3335_v17 = vpack.c.bf16 %v2538_v25, %v2534_v18  ;;  %v2540_v2 = vld [vmem:[%s5174_s3 + $0x38] sm:$0xff]  ;;  %v2574_v25 = vld [vmem:[%s5174_s3 + $0x148] sm:$0xff] }
 0x53e   :  { %3500 = vpow2.f32 %v2836_v41  ;;  %v2838_v8 = vmul.f32 -1.442695, %v1992_v63  ;;  %v2535_v63 = vld [vmem:[%s5174_s3 + $0x10] sm:$0xff] }
 0x53f   :  { %3502 = vpow2.f32 %v2837_v34  ;;  %v2539_v34 = vld [vmem:[%s5174_s3 + $0x30] sm:$0xff] }
 0x540   :  { %3504 = vpow2.f32 %v2838_v8  ;;  %v3369_v8 = vpack.c.bf16 %v2539_v34, %v2535_v63  ;;  %v2575_v34 = vld [vmem:[%s5174_s3 + $0x150] sm:$0xff] }
 0x541   :  { %3506 = vtanh.f32 %v1991_v30  ;;  %v2536_v30 = vld [vmem:[%s5174_s3 + $0x18] sm:$0xff] }
 0x542   :  { %v3367_v41 = vpack.c.bf16 %v2540_v2, %v2536_v30  ;;  %v2578_v30 = vld [vmem:[%s5174_s3 + $0x168] sm:$0xff] }
 0x543   :  { %v3355_v2 = vpack.c.bf16 %v2578_v30, %v2574_v25 }
 0x548   :  { %v3501_v29 = vpop.eup %3500 }
 0x549   :  { %v3503_v36 = vpop.eup %3502  ;;  %v1999_v59 = vadd.f32 1.0, %v3501_v29  ;;  %v2542_v29 = vld [vmem:[%s5174_s3 + $0x48] sm:$0xff] }
 0x54a   :  { %v2000_v13 = vadd.f32 1.0, %v3503_v36  ;;  %v3505_v35 = vpop.eup %3504  ;;  %v2546_v36 = vld [vmem:[%s5174_s3 + $0x68] sm:$0xff] }
 0x54b   :  { %3508 = vrcp.f32 %v1999_v59  ;;  %v3507_v22 = vpop.eup %3506  ;;  %v2009_v0 = vadd.f32 1.0, %v3505_v35  ;;  %v2544_v59 = vld [vmem:[%s5174_s3 + $0x58] sm:$0xff] }
 0x54c   :  { %3510 = vrcp.f32 %v2000_v13  ;;  %v3339_v13 = vpack.c.bf16 %v2546_v36, %v2542_v29  ;;  %v2548_v35 = vld [vmem:[%s5174_s3 + $0x78] sm:$0xff]  ;;  %v2582_v29 = vld [vmem:[%s5174_s3 + $0x188] sm:$0xff] }
 0x54d   :  { %3512 = vrcp.f32 %v2009_v0  ;;  %v2543_v0 = vld [vmem:[%s5174_s3 + $0x50] sm:$0xff] }
 0x555   :  { %v3509_v24 = vpop.eup %3508 }
 0x556   :  { %v3511_v5 = vpop.eup %3510  ;;  %v2013_v60 = vmul.f32 %v3509_v24, %v3507_v22  ;;  %v2541_v22 = vld [vmem:[%s5174_s3 + $0x40] sm:$0xff] }
 0x557   :  { %v2012_v58 = vmul.f32 %v3511_v5, %v4790_v9  ;;  %v3513_v26 = vpop.eup %3512  ;;  %v2545_v24 = vld [vmem:[%s5174_s3 + $0x60] sm:$0xff]  ;;  %v3371_v5 = vpack.c.bf16 %v2548_v35, %v2544_v59  ;;  %v2586_v59 = vld [vmem:[%s5174_s3 + $0x1a8] sm:$0xff]  ;;  %v2588_v35 = vld [vmem:[%s5174_s3 + $0x1b8] sm:$0xff] }
 0x559   :  { %v4853_v51 = vadd.f32 %v2013_v60, %v2012_v58  ;;  %v3341_v60 = vpack.c.bf16 %v2545_v24, %v2541_v22  ;;  %v2547_v58 = vld [vmem:[%s5174_s3 + $0x70] sm:$0xff]  ;;  %v3359_v22 = vpack.c.bf16 %v2586_v59, %v2582_v29  ;;  %v5293_v59 = vld [vmem:[#allocation35_spill] sm:$0xff] }
 0x55b   :  { %3514 = vtanh.f32 %v4853_v51 }
 0x565   :  { %v3515_v62 = vpop.eup %3514 }
 0x566   :  { %v2016_v3 = vmul.f32 %v3515_v62, %v3513_v26  ;;  %v2550_v26 = vld [vmem:[%s5174_s3 + $0x88] sm:$0xff] }
 0x567   :  { %v2554_v62 = vld [vmem:[%s5174_s3 + $0xa8] sm:$0xff] }
 0x568   :  { %2022 = vrot.lane.b32.xlu0 %v2016_v3, %s3592_s15  ;;  %2839 = vst.msk [vmem:[%s5178_s7 + $0x20] sm:$0xff] %vm1019_vm5, %v2016_v3  ;;  %2162 = vmatmul.mubr.f32.vlgmr.msra.gmra.mrb[26].mxu0 %v2016_v3 }
 0x569   :  { %2233 = vmatmul.mubr.f32.vlgmr.msra.gmra.mrb[26].mxu1 %v2016_v3  ;;  %3274 = vmatpush1.bf16.msra.mxu0 %v4438_v56  ;;  %v2552_v3 = vld [vmem:[%s5174_s3 + $0x98] sm:$0xff] }
 0x56a   :  { %3306 = vmatpush1.bf16.msra.mxu1 %v4447_v15  ;;  %3276 = vmatprep.subr.bf16.mxu0 %v4461_v54  ;;  %v5276_v54 = vld [vmem:[#allocation24_spill] sm:$0xff] }
 0x56b   :  { %3308 = vmatprep.subr.bf16.mxu1 %v4472_v7  ;;  %2411 = vmatprep.mubr.f32.mxu0 %v5250_v47 }
 0x56c   :  { %2482 = vmatprep.mubr.f32.mxu1 %v5250_v47 }
 0x56d   :  { %3278 = vmatpush1.bf16.msra.mxu0 %v4474_v10 }
 0x56e   :  { %3310 = vmatpush1.bf16.msra.mxu1 %v4483_v20  ;;  %3280 = vmatprep.subr.bf16.mxu0 %v4497_v33  ;;  %v5277_v33 = vsel %vm4149_vm2, %v5254_v48, %v4128_v44 }
 0x56f   :  { %3312 = vmatprep.subr.bf16.mxu1 %v4508_v46 }
 0x571   :  { %3282 = vmatpush1.bf16.msra.mxu0 %v4510_v49  ;;  %v5278_v49 = vld [vmem:[#allocation11_spill] sm:$0xff] }
 0x572   :  { %3314 = vmatpush1.bf16.msra.mxu1 %v4519_v61  ;;  %3284 = vmatprep.subr.bf16.mxu0 %v4533_v14  ;;  %v5279_v61 = vsel %vm4153_vm3, %v5257_v31, %v5278_v49 }
 0x573   :  { %3316 = vmatprep.subr.bf16.mxu1 %v4544_v32 }
 0x575   :  { %3286 = vmatpush1.bf16.msra.mxu0 %v4546_v37 }
 0x576   :  { %3318 = vmatpush1.bf16.msra.mxu1 %v4555_v50  ;;  %3288 = vmatprep.subr.bf16.mxu0 %v4569_v38  ;;  %v5280_v50 = vld [vmem:[#allocation23_spill] sm:$0xff]  ;;  %v5281_v38 = vld [vmem:[#allocation12_spill] sm:$0xff] }
 0x577   :  { %3320 = vmatprep.subr.bf16.mxu1 %v4580_v12  ;;  %v5282_v12 = vsel %vm4163_vm4, %v5280_v50, %v5281_v38  ;;  %v2564_v50 = vld [vmem:[%s5174_s3 + $0xf8] sm:$0xff]  ;;  %v2557_v38 = vld [vmem:[%s5174_s3 + $0xc0] sm:$0xff] }
 0x579   :  { %3290 = vmatpush1.bf16.msra.mxu0 %v4582_v55 }
 0x57a   :  { %3322 = vmatpush1.bf16.msra.mxu1 %v4595_v21  ;;  %3292 = vmatprep.subr.bf16.mxu0 %v4608_v23 }
 0x57b   :  { %3324 = vmatprep.subr.bf16.mxu1 %v4620_v39 }
 0x57d   :  { %3294 = vmatpush1.bf16.msra.mxu0 %v4622_v42 }
 0x57e   :  { %3326 = vmatpush1.bf16.msra.mxu1 %v4634_v4  ;;  %3296 = vmatprep.subr.bf16.mxu0 %v4646_v27 }
 0x57f   :  { %3328 = vmatprep.subr.bf16.mxu1 %v4648_v45 }
 0x581   :  { %3298 = vmatpush1.bf16.msra.mxu0 %v4660_v11 }
 0x582   :  { %3330 = vmatpush1.bf16.msra.mxu1 %v4673_v6  ;;  %3300 = vmatprep.subr.bf16.mxu0 %v4675_v53 }
 0x583   :  { %3332 = vmatprep.subr.bf16.mxu1 %v4687_v16 }
 0x585   :  { %3302 = vmatpush1.bf16.msra.mxu0 %v4699_v52 }
 0x586   :  { %3334 = vmatpush1.bf16.msra.mxu1 %v4703_v57  ;;  %3336 = vmatprep.subr.bf16.mxu0 %v3335_v17  ;;  %v2576_v17 = vld [vmem:[%s5174_s3 + $0x158] sm:$0xff] }
 0x587   :  { %3368 = vmatprep.subr.bf16.mxu1 %v3367_v41  ;;  %v2577_v41 = vld [vmem:[%s5174_s3 + $0x160] sm:$0xff] }
 0x5da   :  { %v2023_v56 = vpop.permute.xlu0 %2022 }
 0x5db   :  { %2840 = vst.msk [vmem:[%s5179_s8 + $0x18] sm:$0xff] %vm1019_vm5, %v2023_v56  ;;  %v3343_v56 = vpack.c.bf16 %v2554_v62, %v2550_v26  ;;  %v2590_v26 = vld [vmem:[%s5174_s3 + $0x1c8] sm:$0xff] }
 0x5dc   :  { %v2594_v62 = vld [vmem:[%s5174_s3 + $0x1e8] sm:$0xff] }
 0x63b   :  { %v2163_v15 = vpop.f32.mrb[26].mxu0 }
 0x63c   :  { %v2239_v7 = vadd.f32 %v2163_v15, %v5276_v54  ;;  %v2234_v10 = vpop.f32.mrb[26].mxu1  ;;  %v2165_v20 = vpop.f32.mrb[27].mxu0  ;;  %v2556_v15 = vld [vmem:[%s5174_s3 + $0xb8] sm:$0xff]  ;;  %v2549_v54 = vld [vmem:[%s5174_s3 + $0x80] sm:$0xff] }
 0x63d   :  { %v2241_v46 = vadd.f32 %v2234_v10, %v5277_v33  ;;  %v2240_v14 = vadd.f32 %v2165_v20, %v5279_v61  ;;  %v2236_v32 = vpop.f32.mrb[27].mxu1  ;;  %v3375_v10 = vpack.c.bf16 %v2556_v15, %v2552_v3  ;;  %v2551_v33 = vld [vmem:[%s5174_s3 + $0x90] sm:$0xff]  ;;  %v2558_v61 = vld [vmem:[%s5174_s3 + $0xc8] sm:$0xff]  ;;  %v2592_v15 = vld [vmem:[%s5174_s3 + $0x1d8] sm:$0xff] }
 0x63e   :  { %v2841_v37 = vmul.f32 -1.442695, %v2239_v7  ;;  %v2242_v55 = vadd.f32 %v2236_v32, %v5282_v12  ;;  %v2553_v7 = vld [vmem:[%s5174_s3 + $0xa0] sm:$0xff]  ;;  %v2560_v32 = vld [vmem:[%s5174_s3 + $0xd8] sm:$0xff] }
 0x63f   :  { %v2842_v21 = vmul.f32 -1.442695, %v2240_v14  ;;  %v3345_v20 = vpack.c.bf16 %v2553_v7, %v2549_v54  ;;  %v2562_v14 = vld [vmem:[%s5174_s3 + $0xe8] sm:$0xff]  ;;  %v2561_v12 = vld [vmem:[%s5174_s3 + $0xe0] sm:$0xff]  ;;  %v2596_v54 = vld [vmem:[%s5174_s3 + $0x1f8] sm:$0xff] }
 0x640   :  { %3516 = vpow2.f32 %v2841_v37  ;;  %v2843_v23 = vmul.f32 -1.442695, %v2242_v55  ;;  %v3347_v37 = vpack.c.bf16 %v2562_v14, %v2558_v61  ;;  %v3379_v55 = vpack.c.bf16 %v2564_v50, %v2560_v32  ;;  %v2589_v7 = vld [vmem:[%s5174_s3 + $0x1c0] sm:$0xff] }
 0x641   :  { %3518 = vpow2.f32 %v2842_v21  ;;  %v3349_v21 = vpack.c.bf16 %v2561_v12, %v2557_v38  ;;  %v5283_v32 = vld [vmem:[#allocation28_spill] sm:$0xff]  ;;  %v5284_v12 = vld [vmem:[#allocation25_spill] sm:$0xff] }
 0x642   :  { %3520 = vpow2.f32 %v2843_v23  ;;  %v2559_v23 = vld [vmem:[%s5174_s3 + $0xd0] sm:$0xff] }
 0x643   :  { %3522 = vtanh.f32 %v2241_v46  ;;  %v2555_v46 = vld [vmem:[%s5174_s3 + $0xb0] sm:$0xff] }
 0x644   :  { %v3377_v49 = vpack.c.bf16 %v2555_v46, %v2551_v33  ;;  %v2591_v33 = vld [vmem:[%s5174_s3 + $0x1d0] sm:$0xff] }
 0x645   :  { %v2595_v46 = vld [vmem:[%s5174_s3 + $0x1f0] sm:$0xff] }
 0x646   :  { %v3397_v61 = vpack.c.bf16 %v2595_v46, %v2591_v33 }
 0x64a   :  { %v3517_v44 = vpop.eup %3516 }
 0x64b   :  { %v3519_v39 = vpop.eup %3518  ;;  %v2249_v42 = vadd.f32 1.0, %v3517_v44  ;;  %v2563_v44 = vld [vmem:[%s5174_s3 + $0xf0] sm:$0xff] }
 0x64c   :  { %v2250_v4 = vadd.f32 1.0, %v3519_v39  ;;  %v3521_v27 = vpop.eup %3520  ;;  %v3381_v39 = vpack.c.bf16 %v2563_v44, %v2559_v23  ;;  %v5287_v44 = vld [vmem:[#allocation26_spill] sm:$0xff] }
 0x64d   :  { %3524 = vrcp.f32 %v2249_v42  ;;  %v3523_v45 = vpop.eup %3522  ;;  %v2259_v16 = vadd.f32 1.0, %v3521_v27  ;;  %v2566_v42 = vld [vmem:[%s5174_s3 + $0x108] sm:$0xff]  ;;  %v2568_v27 = vld [vmem:[%s5174_s3 + $0x118] sm:$0xff] }
 0x64e   :  { %3526 = vrcp.f32 %v2250_v4  ;;  %v2570_v4 = vld [vmem:[%s5174_s3 + $0x128] sm:$0xff] }
 0x64f   :  { %3528 = vrcp.f32 %v2259_v16 }
 0x657   :  { %v3525_v11 = vpop.eup %3524 }
 0x658   :  { %v3527_v6 = vpop.eup %3526  ;;  %v2263_v53 = vmul.f32 %v3525_v11, %v3523_v45  ;;  %v3351_v45 = vpack.c.bf16 %v2570_v4, %v2566_v42  ;;  %v2572_v11 = vld [vmem:[%s5174_s3 + $0x138] sm:$0xff] }
 0x659   :  { %v2262_v52 = vmul.f32 %v3527_v6, %v4853_v51  ;;  %v3529_v48 = vpop.eup %3528  ;;  %v3373_v51 = vpack.c.bf16 %v2547_v58, %v2543_v0  ;;  %v2565_v6 = vld [vmem:[%s5174_s3 + $0x100] sm:$0xff]  ;;  %v2583_v0 = vld [vmem:[%s5174_s3 + $0x190] sm:$0xff] }
 0x65b   :  { %v4914_v57 = vadd.f32 %v2263_v53, %v2262_v52  ;;  %v2569_v53 = vld [vmem:[%s5174_s3 + $0x120] sm:$0xff]  ;;  %v3383_v52 = vpack.c.bf16 %v2572_v11, %v2568_v27  ;;  %v5290_v11 = vld [vmem:[#allocation27_spill] sm:$0xff] }
 0x65d   :  { %3530 = vtanh.f32 %v4914_v57 }
 0x667   :  { %v3531_v31 = vpop.eup %3530 }
 0x668   :  { %v2266_v9 = vmul.f32 %v3531_v31, %v3529_v48  ;;  %v3353_v48 = vpack.c.bf16 %v2569_v53, %v2565_v6  ;;  %v2567_v31 = vld [vmem:[%s5174_s3 + $0x110] sm:$0xff] }
 0x669   :  { %v5291_v6 = vld [vmem:[#allocation10_spill] sm:$0xff] }
 0x66a   :  { %2272 = vrot.lane.b32.xlu1 %v2266_v9, %s3592_s15  ;;  %2844 = vst.msk [vmem:[%s5178_s7 + $0x28] sm:$0xff] %vm1019_vm5, %v2266_v9  ;;  %2412 = vmatmul.mubr.f32.vlgmr.msra.gmra.mrb[28].mxu0 %v2266_v9  ;;  %v5292_v53 = vsel %vm4163_vm4, %v5290_v11, %v5291_v6 }
 0x66b   :  { %2483 = vmatmul.mubr.f32.vlgmr.msra.gmra.mrb[28].mxu1 %v2266_v9  ;;  %2661 = vmatprep.mubr.f32.mxu0 %v5250_v47  ;;  %v2571_v9 = vld [vmem:[%s5174_s3 + $0x130] sm:$0xff] }
 0x66c   :  { %2732 = vmatprep.mubr.f32.mxu1 %v5250_v47  ;;  %v2533_v47 = vld [vmem:[%s5174_s3] sm:$0xff]  ;;  %3370 = vmatpush1.bf16.msra.mxu1 %v3369_v8  ;;  %v3385_v18 = vpack.c.bf16 %v2571_v9, %v2567_v31  ;;  %v2579_v8 = vld [vmem:[%s5174_s3 + $0x170] sm:$0xff] }
 0x66d   :  { %v3337_v1 = vpack.c.bf16 %v2537_v19, %v2533_v47  ;;  %3372 = vmatprep.subr.bf16.mxu1 %v3371_v5  ;;  %v2580_v47 = vld [vmem:[%s5174_s3 + $0x178] sm:$0xff]  ;;  %v2573_v19 = vld [vmem:[%s5174_s3 + $0x140] sm:$0xff]  ;;  %v3389_v36 = vpack.c.bf16 %v2579_v8, %v2575_v34 }
 0x66e   :  { %v3357_v63 = vpack.c.bf16 %v2577_v41, %v2573_v19  ;;  %v2581_v5 = vld [vmem:[%s5174_s3 + $0x180] sm:$0xff] }
 0x66f   :  { %3338 = vmatpush1.bf16.msra.mxu0 %v3337_v1  ;;  %v3387_v1 = vpack.c.bf16 %v2580_v47, %v2576_v17 }
 0x670   :  { %3340 = vmatprep.subr.bf16.mxu0 %v3339_v13  ;;  %3374 = vmatpush1.bf16.msra.mxu1 %v3373_v51  ;;  %v2584_v13 = vld [vmem:[%s5174_s3 + $0x198] sm:$0xff]  ;;  %v2587_v51 = vld [vmem:[%s5174_s3 + $0x1b0] sm:$0xff] }
 0x671   :  { %3376 = vmatprep.subr.bf16.mxu1 %v3375_v10  ;;  %v3391_v24 = vpack.c.bf16 %v2588_v35, %v2584_v13  ;;  %v3393_v3 = vpack.c.bf16 %v2587_v51, %v2583_v0  ;;  %v3395_v10 = vpack.c.bf16 %v2596_v54, %v2592_v15  ;;  %v5298_v51 = vld [vmem:[#allocation30_spill] sm:$0xff]  ;;  %v5301_v54 = vld [vmem:[#allocation33_spill] sm:$0xff] }
 0x672   :  { %v5300_v15 = vld [vmem:[#allocation34_spill] sm:$0xff] }
 0x673   :  { %3342 = vmatpush1.bf16.msra.mxu0 %v3341_v60  ;;  %v2585_v60 = vld [vmem:[%s5174_s3 + $0x1a0] sm:$0xff] }
 0x674   :  { %3344 = vmatprep.subr.bf16.mxu0 %v3343_v56  ;;  %3378 = vmatpush1.bf16.msra.mxu1 %v3377_v49  ;;  %v3361_v58 = vpack.c.bf16 %v2585_v60, %v2581_v5  ;;  %v3363_v56 = vpack.c.bf16 %v2594_v62, %v2590_v26  ;;  %v5295_v5 = vld [vmem:[#allocation29_spill] sm:$0xff] }
 0x675   :  { %3380 = vmatprep.subr.bf16.mxu1 %v3379_v55  ;;  %v5285_v55 = vld [vmem:[#allocation8_spill] sm:$0xff] }
 0x677   :  { %3346 = vmatpush1.bf16.msra.mxu0 %v3345_v20  ;;  %v2593_v20 = vld [vmem:[%s5174_s3 + $0x1e0] sm:$0xff] }
 0x678   :  { %3348 = vmatprep.subr.bf16.mxu0 %v3347_v37  ;;  %3382 = vmatpush1.bf16.msra.mxu1 %v3381_v39  ;;  %v3365_v49 = vpack.c.bf16 %v2593_v20, %v2589_v7  ;;  %v5288_v39 = vld [vmem:[#allocation9_spill] sm:$0xff]  ;;  %v5302_v7 = vsel %vm4163_vm4, %v5300_v15, %v5301_v54 }
 0x679   :  { %3384 = vmatprep.subr.bf16.mxu1 %v3383_v52  ;;  %v5289_v42 = vsel %vm4153_vm3, %v5287_v44, %v5288_v39 }
 0x67b   :  { %3350 = vmatpush1.bf16.msra.mxu0 %v3349_v21  ;;  %v5286_v21 = vsel %vm4149_vm2, %v5284_v12, %v5285_v55 }
 0x67c   :  { %3352 = vmatprep.subr.bf16.mxu0 %v3351_v45  ;;  %3386 = vmatpush1.bf16.msra.mxu1 %v3385_v18 }
 0x67d   :  { %3388 = vmatprep.subr.bf16.mxu1 %v3387_v1 }
 0x67f   :  { %3354 = vmatpush1.bf16.msra.mxu0 %v3353_v48 }
 0x680   :  { %3356 = vmatprep.subr.bf16.mxu0 %v3355_v2  ;;  %3390 = vmatpush1.bf16.msra.mxu1 %v3389_v36 }
 0x681   :  { %3392 = vmatprep.subr.bf16.mxu1 %v3391_v24  ;;  %v5294_v24 = vld [vmem:[#allocation31_spill] sm:$0xff] }
 0x682   :  { %v5296_v60 = vsel %vm4149_vm2, %v5294_v24, %v5295_v5 }
 0x683   :  { %3358 = vmatpush1.bf16.msra.mxu0 %v3357_v63 }
 0x684   :  { %3360 = vmatprep.subr.bf16.mxu0 %v3359_v22  ;;  %3394 = vmatpush1.bf16.msra.mxu1 %v3393_v3 }
 0x685   :  { %3396 = vmatprep.subr.bf16.mxu1 %v3395_v10 }
 0x687   :  { %3362 = vmatpush1.bf16.msra.mxu0 %v3361_v58  ;;  %v5297_v58 = vld [vmem:[#allocation32_spill] sm:$0xff] }
 0x688   :  { %3364 = vmatprep.subr.bf16.mxu0 %v3363_v56  ;;  %3398 = vmatpush1.bf16.msra.mxu1 %v3397_v61  ;;  %v5299_v26 = vsel %vm4153_vm3, %v5297_v58, %v5298_v51 }
 0x68b   :  { %3366 = vmatpush1.bf16.msra.mxu0 %v3365_v49 }
 0x6dc   :  { %v2273_v16 = vpop.permute.xlu1 %2272 }
 0x6dd   :  { %2845 = vst.msk [vmem:[%s5179_s8 + $0x10] sm:$0xff] %vm1019_vm5, %v2273_v16 }
 0x73d   :  { %v2413_v14 = vpop.f32.mrb[28].mxu0 }
 0x73e   :  { %v2489_v37 = vadd.f32 %v2413_v14, %v5283_v32  ;;  %v2484_v50 = vpop.f32.mrb[28].mxu1  ;;  %v2415_v38 = vpop.f32.mrb[29].mxu0 }
 0x73f   :  { %v2491_v23 = vadd.f32 %v2484_v50, %v5286_v21  ;;  %v2490_v4 = vadd.f32 %v2415_v38, %v5289_v42  ;;  %v2486_v27 = vpop.f32.mrb[29].mxu1 }
 0x740   :  { %v2846_v45 = vmul.f32 -1.442695, %v2489_v37  ;;  %v2492_v16 = vadd.f32 %v2486_v27, %v5292_v53 }
 0x741   :  { %v2847_v52 = vmul.f32 -1.442695, %v2490_v4 }
 0x742   :  { %3532 = vpow2.f32 %v2846_v45  ;;  %v2848_v48 = vmul.f32 -1.442695, %v2492_v16 }
 0x743   :  { %3534 = vpow2.f32 %v2847_v52 }
 0x744   :  { %3536 = vpow2.f32 %v2848_v48 }
 0x745   :  { %3538 = vtanh.f32 %v2491_v23 }
 0x74c   :  { %v3533_v31 = vpop.eup %3532 }
 0x74d   :  { %v3535_v9 = vpop.eup %3534  ;;  %v2499_v18 = vadd.f32 1.0, %v3533_v31 }
 0x74e   :  { %v2500_v25 = vadd.f32 1.0, %v3535_v9  ;;  %v3537_v30 = vpop.eup %3536 }
 0x74f   :  { %3540 = vrcp.f32 %v2499_v18  ;;  %v3539_v17 = vpop.eup %3538  ;;  %v2509_v41 = vadd.f32 1.0, %v3537_v30 }
 0x750   :  { %3542 = vrcp.f32 %v2500_v25 }
 0x751   :  { %3544 = vrcp.f32 %v2509_v41 }
 0x759   :  { %v3541_v2 = vpop.eup %3540 }
 0x75a   :  { %v3543_v47 = vpop.eup %3542  ;;  %v2513_v19 = vmul.f32 %v3541_v2, %v3539_v17 }
 0x75b   :  { %v2512_v1 = vmul.f32 %v3543_v47, %v4914_v57  ;;  %v3545_v34 = vpop.eup %3544 }
 0x75d   :  { %v2514_v63 = vadd.f32 %v2513_v19, %v2512_v1 }
 0x75f   :  { %3546 = vtanh.f32 %v2514_v63 }
 0x769   :  { %v3547_v8 = vpop.eup %3546 }
 0x76a   :  { %v2516_v29 = vmul.f32 %v3547_v8, %v3545_v34 }
 0x76c   :  { %2522 = vrot.lane.b32.xlu0 %v2516_v29, %s3592_s15  ;;  %2849 = vst.msk [vmem:[%s5178_s7 + $0x30] sm:$0xff] %vm1019_vm5, %v2516_v29  ;;  %2662 = vmatmul.mubr.f32.vlgmr.msra.gmra.mrb[30].mxu0 %v2516_v29 }
 0x76d   :  { %2733 = vmatmul.mubr.f32.vlgmr.msra.gmra.mrb[30].mxu1 %v2516_v29 }
 0x7de   :  { %v2523_v36 = vpop.permute.xlu0 %2522 }
 0x7df   :  { %2850 = vst.msk [vmem:[%s5179_s8 + $0x8] sm:$0xff] %vm1019_vm5, %v2523_v36 }
 0x83f   :  { %v2663_v57 = vpop.f32.mrb[30].mxu0 }
 0x840   :  { %v2739_v13 = vadd.f32 %v2663_v57, %v5293_v59  ;;  %v2734_v35 = vpop.f32.mrb[30].mxu1  ;;  %v2665_v22 = vpop.f32.mrb[31].mxu0 }
 0x841   :  { %v2741_v0 = vadd.f32 %v2734_v35, %v5296_v60  ;;  %v2740_v62 = vadd.f32 %v2665_v22, %v5299_v26  ;;  %v2736_v3 = vpop.f32.mrb[31].mxu1 }
 0x842   :  { %v2851_v56 = vmul.f32 -1.442695, %v2739_v13  ;;  %v2742_v10 = vadd.f32 %v2736_v3, %v5302_v7 }
 0x843   :  { %v2852_v20 = vmul.f32 -1.442695, %v2740_v62 }
 0x844   :  { %3548 = vpow2.f32 %v2851_v56  ;;  %v2853_v40 = vmul.f32 -1.442695, %v2742_v10 }
 0x845   :  { %3550 = vpow2.f32 %v2852_v20 }
 0x846   :  { %3552 = vpow2.f32 %v2853_v40 }
 0x847   :  { %3554 = vtanh.f32 %v2741_v0 }
 0x84e   :  { %v3549_v33 = vpop.eup %3548 }
 0x84f   :  { %v3551_v46 = vpop.eup %3550  ;;  %v2749_v49 = vadd.f32 1.0, %v3549_v33 }
 0x850   :  { %v2750_v43 = vadd.f32 1.0, %v3551_v46  ;;  %v3553_v61 = vpop.eup %3552 }
 0x851   :  { %3556 = vrcp.f32 %v2749_v49  ;;  %v3555_v14 = vpop.eup %3554  ;;  %v2759_v50 = vadd.f32 1.0, %v3553_v61 }
 0x852   :  { %3558 = vrcp.f32 %v2750_v43 }
 0x853   :  { %3560 = vrcp.f32 %v2759_v50 }
 0x85b   :  { %v3557_v32 = vpop.eup %3556 }
 0x85c   :  { %v3559_v28 = vpop.eup %3558  ;;  %v2763_v37 = vmul.f32 %v3557_v32, %v3555_v14 }
 0x85d   :  { %v2762_v38 = vmul.f32 %v3559_v28, %v2514_v63  ;;  %v3561_v55 = vpop.eup %3560 }
 0x85f   :  { %v2764_v12 = vadd.f32 %v2763_v37, %v2762_v38 }
 0x861   :  { %3562 = vtanh.f32 %v2764_v12 }
 0x86b   :  { %v3563_v21 = vpop.eup %3562 }
 0x86c   :  { %v2766_v23 = vmul.f32 %v3563_v21, %v3561_v55 }
 0x86e   :  { %2772 = vrot.lane.b32.xlu1 %v2766_v23, %s3592_s15  ;;  %2854 = vst.msk [vmem:[%s5178_s7 + $0x38] sm:$0xff] %vm1019_vm5, %v2766_v23 }
 0x8e0   :  { %v2773_v44 = vpop.permute.xlu1 %2772 }
 0x8e1   :  { %2775 = vst.msk [vmem:[%s5179_s8] sm:$0xff] %vm1019_vm5, %v2773_v44 }
 0x8e2   :  { %2784 = vsyncpa [#allocation6], 1 }

</bundles_post_ra>
